<compile_context>
chip_gen: v7x
topology: tpu7x:2x2x1
jax: 0.10.0
libtpu: 0.0.40
codegen_flags: <defaults>
</compile_context>

<pallas_src>
import functools

import jax
import jax.numpy as jnp
from jax import lax
from jax.experimental import pallas as pl
from jax.experimental.pallas import tpu as pltpu

LANES = 128
SUBLANES = 8
ACC_ROWS = 32            # 4 independent (8,128)-vreg accumulation chains per quantity
SUB_TARGET = 512         # rows per inner unrolled chunk: 512*128*4B = 256 KiB
MIN_KERNEL_ELEMS = 1 << 16
EPS = 1e-5


def _iou_loss_ref(pred, target):
    """Pure-JAX reference mirroring the PyTorch forward exactly."""
    p0 = pred.astype(jnp.float32)
    g0 = target.astype(jnp.float32)
    p1 = 1.0 - p0
    g1 = 1.0 - g0
    num = jnp.sum(p0 * g0)
    den = num + 0.5 * jnp.sum(p0 * g1) + 0.5 * jnp.sum(p1 * g0)
    return 1.0 - num / (den + EPS)


def _iou_partial_kernel(p_ref, g_ref, o_ref, *, tm, sub, rows, nblocks, steps,
                        mask_tail):
    c = pl.program_id(0)   # split axis ("parallel")
    i = pl.program_id(1)   # reduction axis ("arbitrary")

    @pl.when(i == 0)
    def _():
        o_ref[...] = jnp.zeros_like(o_ref)

    zero = jnp.zeros((ACC_ROWS, LANES), jnp.float32)

    def chunk(k, valid_rows=None):
        off = pl.multiple_of(k * sub, sub)
        ps = p_ref[pl.ds(off, sub), :].astype(jnp.float32)
        gs = g_ref[pl.ds(off, sub), :].astype(jnp.float32)
        if valid_rows is not None:
            # Only the single tail tile pays for this mask (garbage rows -> 0).
            rid = lax.broadcasted_iota(jnp.int32, (sub, LANES), 0) + k * sub
            keep = rid < valid_rows
            ps = jnp.where(keep, ps, 0.0)
            gs = jnp.where(keep, gs, 0.0)
        ps3 = ps.reshape(sub // ACC_ROWS, ACC_ROWS, LANES)
        gs3 = gs.reshape(sub // ACC_ROWS, ACC_ROWS, LANES)
        return (ps3 * gs3).sum(axis=0), (ps3 + gs3).sum(axis=0)

    def reduce_tile(n_chunks, valid_rows=None):
        def body(k, carry):
            a_pg, a_sg = carry
            d_pg, d_sg = chunk(k, valid_rows)
            return a_pg + d_pg, a_sg + d_sg
        return lax.fori_loop(0, n_chunks, body, (zero, zero), unroll=True)

    if mask_tail:
        valid = rows - (nblocks - 1) * tm            # static python int
        n_valid_chunks = -(-valid // sub)            # static python int
        is_tail = (c * steps + i) == (nblocks - 1)

        @pl.when(jnp.logical_not(is_tail))
        def _():
            pg_acc, sg_acc = reduce_tile(tm // sub)
            o_ref[0, 0, :, :] += pg_acc
            o_ref[0, 1, :, :] += sg_acc

        @pl.when(is_tail)
        def _():
            pg_acc, sg_acc = reduce_tile(n_valid_chunks, valid)
            o_ref[0, 0, :, :] += pg_acc
            o_ref[0, 1, :, :] += sg_acc
    else:
        pg_acc, sg_acc = reduce_tile(tm // sub)
        o_ref[0, 0, :, :] += pg_acc
        o_ref[0, 1, :, :] += sg_acc


def _round_up(x, m):
    return ((x + m - 1) // m) * m


def _pick_sub(tm):
    for s in (SUB_TARGET, 256, 128, 64, ACC_ROWS):
        if tm % s == 0:
            return s
    raise ValueError(f"tile rows {tm} must be a multiple of {ACC_ROWS}")


def _default_tile_rows():
    # v7x: ~2.5x the per-TC HBM bandwidth of v6e, so bigger tiles amortize the fixed
    # per-step cost; 2 inputs x 2 buffers x 4 MiB = 16 MiB still fits its 64 MiB VMEM.
    # v5e/v6e: 4096 rows (2 MiB blocks, ~10 MiB total) stays under every default.
    try:
        kind = jax.devices()[0].device_kind.lower()
    except Exception:
        kind = ""
    if "v7" in kind or "7x" in kind:
        return 8192
    return 4096


def iou_loss(pred, target, *, tile_rows=None, min_kernel_elems=MIN_KERNEL_ELEMS):
    """Pallas-TPU implementation of IOULoss.forward(pred, target) -> scalar."""
    assert pred.shape == target.shape
    if not jnp.issubdtype(pred.dtype, jnp.floating):
        pred = pred.astype(jnp.float32)
    if not jnp.issubdtype(target.dtype, jnp.floating):
        target = target.astype(jnp.float32)

    n = pred.size
    # Below this size the kernel launch can never pay for itself; also guarantees
    # rows >= ACC_ROWS on the kernel path.
    if n < max(min_kernel_elems, ACC_ROWS * LANES):
        return _iou_loss_ref(pred, target)

    p_flat = jnp.ravel(pred)
    g_flat = jnp.ravel(target)

    rem = n % LANES
    if rem:
        # Pad only the last partial 128-lane row; zeros contribute nothing to either
        # sum.  This copy only happens for genuinely lane-unaligned inputs.
        # TODO(synk): stream unaligned inputs through 1-D blocks to avoid this copy.
        pad = LANES - rem
        p_flat = jnp.pad(p_flat, (0, pad))
        g_flat = jnp.pad(g_flat, (0, pad))

    rows = p_flat.shape[0] // LANES
    p2d = p_flat.reshape(rows, LANES)   # free bitcast-reshape
    g2d = g_flat.reshape(rows, LANES)

    tm = tile_rows if tile_rows is not None else _default_tile_rows()
    tm = max(ACC_ROWS, min(tm, rows))
    tm = (tm // ACC_ROWS) * ACC_ROWS          # multiple of 32, <= rows
    sub = _pick_sub(tm)

    nblocks = -(-rows // tm)
    # Use 2 splits only when they divide the block count exactly: never any
    # over-provisioned / clamped tiles (harmless sequential loop on 1-TC chips,
    # megacore-parallel on v7x).
    n_splits = 2 if (nblocks % 2 == 0) else 1
    steps = nblocks // n_splits
    assert n_splits * steps == nblocks
    mask_tail = (rows % tm) != 0
    if not mask_tail:
        assert nblocks * tm == rows

    kernel = functools.partial(
        _iou_partial_kernel, tm=tm, sub=sub, rows=rows, nblocks=nblocks,
        steps=steps, mask_tail=mask_tail)

    # 2 inputs x 2 pipeline buffers x block bytes, plus slack for temporaries/output.
    blk_bytes = tm * LANES * (p2d.dtype.itemsize + g2d.dtype.itemsize)
    vmem_bytes = int(2 * blk_bytes + (4 << 20))

    in_map = lambda c, i: (c * steps + i, 0)

    parts = pl.pallas_call(
        kernel,
        out_shape=jax.ShapeDtypeStruct((n_splits, 2, ACC_ROWS, LANES), jnp.float32),
        grid_spec=pltpu.PrefetchScalarGridSpec(
            num_scalar_prefetch=0,
            grid=(n_splits, steps),
            in_specs=[
                pl.BlockSpec((tm, LANES), in_map),
                pl.BlockSpec((tm, LANES), in_map),
            ],
            out_specs=pl.BlockSpec((1, 2, ACC_ROWS, LANES),
                                   lambda c, i: (c, 0, 0, 0)),
        ),
        compiler_params=pltpu.CompilerParams(
            dimension_semantics=("parallel", "arbitrary"),
            vmem_limit_bytes=vmem_bytes,
        ),
    )(p2d, g2d)

    # Tiny epilogue on (n_splits, 2, 32, 128) partials.
    num = jnp.sum(parts[:, 0])
    sum_p_plus_g = jnp.sum(parts[:, 1])
    den = 0.5 * sum_p_plus_g   # == num + 0.5*sum(p*(1-g)) + 0.5*sum((1-p)*g)
    return 1.0 - num / (den + EPS)


if __name__ == "__main__":
    key = jax.random.PRNGKey(0)
    k1, k2, k3, k4 = jax.random.split(key, 4)

    # Primary check: lane-aligned NCHW segmentation maps (runs the Pallas kernel).
    shape = (2, 4, 128, 128)
    pred = jax.nn.sigmoid(jax.random.normal(k1, shape, dtype=jnp.float32))
    target = (jax.random.uniform(k2, shape) > 0.5).astype(jnp.float32)
    loss = jax.block_until_ready(iou_loss(pred, target))
    ref = jax.block_until_ready(_iou_loss_ref(pred, target))
    assert jnp.allclose(loss, ref, rtol=1e-4, atol=1e-5), (loss, ref)

    # Unaligned check: exercises the <=127-element pad and the masked tail tile.
    shape2 = (2, 3, 97, 113)
    pred2 = jax.nn.sigmoid(jax.random.normal(k3, shape2, dtype=jnp.float32))
    target2 = (jax.random.uniform(k4, shape2) > 0.5).astype(jnp.float32)
    loss2 = jax.block_until_ready(iou_loss(pred2, target2))
    ref2 = jax.block_until_ready(_iou_loss_ref(pred2, target2))
    assert jnp.allclose(loss2, ref2, rtol=1e-4, atol=1e-5), (loss2, ref2)

    print("KERNEL_OK")
</pallas_src>

<mosaic_0001>
module attributes {stable_mosaic.version = 11 : i64} {
  func.func @_iou_partial_kernel(%arg0: i32, %arg1: i32, %arg2: memref<1024x128xf32, #tpu.memory_space<vmem>>, %arg3: memref<1024x128xf32, #tpu.memory_space<vmem>>, %arg4: memref<1x2x32x128xf32, #tpu.memory_space<vmem>>) attributes {dimension_semantics = [#tpu.dimension_semantics<parallel>, #tpu.dimension_semantics<arbitrary>], iteration_bounds = array<i64: 1, 1>, scalar_prefetch = 0 : i64, scratch_operands = 0 : i64, tpu.core_type = #tpu.core_type<tc>, window_params = [{transform_indices = @transform_0, window_bounds = array<i64: 1024, 128>}, {transform_indices = @transform_1, window_bounds = array<i64: 1024, 128>}, {transform_indices = @transform_2, window_bounds = array<i64: 1, 2, 32, 128>}]} {
    %c0_i32 = arith.constant 0 : i32
    %0 = arith.cmpi eq, %arg1, %c0_i32 : i32
    %1 = arith.extui %0 : i1 to i32
    %c0_i32_0 = arith.constant 0 : i32
    %2 = arith.cmpi ne, %1, %c0_i32_0 : i32
    scf.if %2 {
      %cst_25 = arith.constant 0.000000e+00 : f32
      %44 = vector.broadcast %cst_25 : f32 to vector<1x2x32x128xf32>
      %c0_26 = arith.constant 0 : index
      %c0_27 = arith.constant 0 : index
      %c0_28 = arith.constant 0 : index
      %c0_29 = arith.constant 0 : index
      %45 = vector.load %arg4[%c0_26, %c0_27, %c0_28, %c0_29] : memref<1x2x32x128xf32, #tpu.memory_space<vmem>>, vector<1x2x32x128xf32>
      tpu.vector_store %arg4[%c0_26, %c0_27, %c0_28, %c0_29], %44 {strides = array<i32>} : memref<1x2x32x128xf32, #tpu.memory_space<vmem>>, vector<1x2x32x128xf32>,
    } else {
    }
    %cst = arith.constant 0.000000e+00 : f32
    %3 = vector.broadcast %cst : f32 to vector<32x128xf32>
    %c0_i32_1 = arith.constant 0 : i32
    %c512_i32 = arith.constant 512 : i32
    %4 = arith.muli %c0_i32_1, %c512_i32 : i32
    %5 = tpu.assume_multiple %4, 512 : i32
    %6 = arith.index_cast %5 : i32 to index
    %c0 = arith.constant 0 : index
    %7 = vector.load %arg2[%6, %c0] : memref<1024x128xf32, #tpu.memory_space<vmem>>, vector<512x128xf32>
    %8 = arith.index_cast %5 : i32 to index
    %c0_2 = arith.constant 0 : index
    %9 = vector.load %arg3[%8, %c0_2] : memref<1024x128xf32, #tpu.memory_space<vmem>>, vector<512x128xf32>
    %10 = vector.shape_cast %7 : vector<512x128xf32> to vector<16x32x128xf32>
    %11 = vector.shape_cast %9 : vector<512x128xf32> to vector<16x32x128xf32>
    %12 = arith.mulf %10, %11 : vector<16x32x128xf32>
    %cst_3 = arith.constant dense<0.000000e+00> : vector<32x128xf32>
    %13 = vector.multi_reduction <add>, %12, %cst_3 [0] : vector<16x32x128xf32> to vector<32x128xf32>
    %14 = arith.addf %10, %11 : vector<16x32x128xf32>
    %cst_4 = arith.constant dense<0.000000e+00> : vector<32x128xf32>
    %15 = vector.multi_reduction <add>, %14, %cst_4 [0] : vector<16x32x128xf32> to vector<32x128xf32>
    %16 = arith.addf %3, %13 : vector<32x128xf32>
    %17 = arith.addf %3, %15 : vector<32x128xf32>
    %c1_i32 = arith.constant 1 : i32
    %c512_i32_5 = arith.constant 512 : i32
    %18 = arith.muli %c1_i32, %c512_i32_5 : i32
    %19 = tpu.assume_multiple %18, 512 : i32
    %20 = arith.index_cast %19 : i32 to index
    %c0_6 = arith.constant 0 : index
    %21 = vector.load %arg2[%20, %c0_6] : memref<1024x128xf32, #tpu.memory_space<vmem>>, vector<512x128xf32>
    %22 = arith.index_cast %19 : i32 to index
    %c0_7 = arith.constant 0 : index
    %23 = vector.load %arg3[%22, %c0_7] : memref<1024x128xf32, #tpu.memory_space<vmem>>, vector<512x128xf32>
    %24 = vector.shape_cast %21 : vector<512x128xf32> to vector<16x32x128xf32>
    %25 = vector.shape_cast %23 : vector<512x128xf32> to vector<16x32x128xf32>
    %26 = arith.mulf %24, %25 : vector<16x32x128xf32>
    %cst_8 = arith.constant dense<0.000000e+00> : vector<32x128xf32>
    %27 = vector.multi_reduction <add>, %26, %cst_8 [0] : vector<16x32x128xf32> to vector<32x128xf32>
    %28 = arith.addf %24, %25 : vector<16x32x128xf32>
    %cst_9 = arith.constant dense<0.000000e+00> : vector<32x128xf32>
    %29 = vector.multi_reduction <add>, %28, %cst_9 [0] : vector<16x32x128xf32> to vector<32x128xf32>
    %30 = arith.addf %16, %27 : vector<32x128xf32>
    %31 = arith.addf %17, %29 : vector<32x128xf32>
    %c2_i32 = arith.constant 2 : i32
    %c0_10 = arith.constant 0 : index
    %c0_11 = arith.constant 0 : index
    %c0_12 = arith.constant 0 : index
    %c0_13 = arith.constant 0 : index
    %32 = vector.load %arg4[%c0_10, %c0_11, %c0_12, %c0_13] : memref<1x2x32x128xf32, #tpu.memory_space<vmem>>, vector<1x1x32x128xf32>
    %33 = vector.shape_cast %32 : vector<1x1x32x128xf32> to vector<32x128xf32>
    %34 = arith.addf %33, %30 : vector<32x128xf32>
    %c0_14 = arith.constant 0 : index
    %c0_15 = arith.constant 0 : index
    %c0_16 = arith.constant 0 : index
    %c0_17 = arith.constant 0 : index
    %35 = vector.load %arg4[%c0_14, %c0_15, %c0_16, %c0_17] : memref<1x2x32x128xf32, #tpu.memory_space<vmem>>, vector<1x1x32x128xf32>
    %36 = vector.shape_cast %35 : vector<1x1x32x128xf32> to vector<32x128xf32>
    %37 = vector.shape_cast %34 : vector<32x128xf32> to vector<1x1x32x128xf32>
    tpu.vector_store %arg4[%c0_14, %c0_15, %c0_16, %c0_17], %37 {strides = array<i32>} : memref<1x2x32x128xf32, #tpu.memory_space<vmem>>, vector<1x1x32x128xf32>,
    %c0_18 = arith.constant 0 : index
    %c1 = arith.constant 1 : index
    %c0_19 = arith.constant 0 : index
    %c0_20 = arith.constant 0 : index
    %38 = vector.load %arg4[%c0_18, %c1, %c0_19, %c0_20] : memref<1x2x32x128xf32, #tpu.memory_space<vmem>>, vector<1x1x32x128xf32>
    %39 = vector.shape_cast %38 : vector<1x1x32x128xf32> to vector<32x128xf32>
    %40 = arith.addf %39, %31 : vector<32x128xf32>
    %c0_21 = arith.constant 0 : index
    %c1_22 = arith.constant 1 : index
    %c0_23 = arith.constant 0 : index
    %c0_24 = arith.constant 0 : index
    %41 = vector.load %arg4[%c0_21, %c1_22, %c0_23, %c0_24] : memref<1x2x32x128xf32, #tpu.memory_space<vmem>>, vector<1x1x32x128xf32>
    %42 = vector.shape_cast %41 : vector<1x1x32x128xf32> to vector<32x128xf32>
    %43 = vector.shape_cast %40 : vector<32x128xf32> to vector<1x1x32x128xf32>
    tpu.vector_store %arg4[%c0_21, %c1_22, %c0_23, %c0_24], %43 {strides = array<i32>} : memref<1x2x32x128xf32, #tpu.memory_space<vmem>>, vector<1x1x32x128xf32>,
    return
  }
  func.func @transform_0(%arg0: i32, %arg1: i32) -> (i32, i32) {
    %c1_i32 = arith.constant 1 : i32
    %0 = arith.muli %arg0, %c1_i32 : i32
    %1 = arith.addi %0, %arg1 : i32
    %c0_i32 = arith.constant 0 : i32
    %c0_i32_0 = arith.constant 0 : i32
    return %1, %c0_i32 : i32, i32
  }
  func.func @transform_1(%arg0: i32, %arg1: i32) -> (i32, i32) {
    %c1_i32 = arith.constant 1 : i32
    %0 = arith.muli %arg0, %c1_i32 : i32
    %1 = arith.addi %0, %arg1 : i32
    %c0_i32 = arith.constant 0 : i32
    %c0_i32_0 = arith.constant 0 : i32
    return %1, %c0_i32 : i32, i32
  }
  func.func @transform_2(%arg0: i32, %arg1: i32) -> (i32, i32, i32, i32) {
    %c0_i32 = arith.constant 0 : i32
    %c0_i32_0 = arith.constant 0 : i32
    %c0_i32_1 = arith.constant 0 : i32
    %c0_i32_2 = arith.constant 0 : i32
    return %arg0, %c0_i32, %c0_i32_0, %c0_i32_1 : i32, i32, i32, i32
  }
}

</mosaic_0001>

<bundles_post_ra>
// kernel: tpu_custom_call.1
= control target key start
LH: loop header
LB: loop body
LE: loop exit
PB: predicated region body
PF: predicated region fallthrough
CT: control target
= control target key end

     0   :  { %7 = vsyncpa [#allocation3], 0  ;;  %s2241_s0 = inlined_call_operand.hbm [shape: f32[1024,128], index: 0, kind: input, shape index: {}]   ;;  %s2242_s1 = inlined_call_operand.hbm [shape: f32[1024,128], index: 1, kind: input, shape index: {}]   ;;  %s2243_s2 = inlined_call_operand.hbm [shape: f32[1,2,32,128], index: 2, kind: output, shape index: {}]  }
   0x1   :  { %8 = vsyncpa [#allocation6], 0 }
   0x2   :  { %9 = vsyncpa [#allocation4], 0  ;;  %s955_s9 = smov [#allocation2]   ;;  %s883_s13 = scalar_lea.hbm %s2241_s0, 16384 }
   0x3   :  { %s19_s10 = sshll.u32 %s955_s9, 4  ;;  %p884_p0 = scmp.ne.s32.totalorder %s2241_s0, %s883_s13  ;;  %s20_s10 = int_to_ptr.vmem [resolvable:$true] %s19_s10 }
   0x4   :  { %p887_p1 = scmp.lt.u32.totalorder %s883_s13, %s2241_s0 }
   0x6   :  { %p889_p2 = pnand %p887_p1, %p884_p0 }
   0x8   :  { %892 = shalt.err (!%p889_p2)
}
   0x9   :  { %s893_s18 = scalar_lea.vmem %s20_s10, 16384  ;;  %p898_p4 = scmp.lt.s32.totalorder %s20_s10, %s20_s10 }
   0xa   :  { %p894_p3 = scmp.ne.s32.totalorder %s20_s10, %s893_s18  ;;  %p899_p5 = scmp.lt.s32.totalorder %s893_s18, %s893_s18 }
   0xc   :  { %p900_p6 = por %p899_p5, %p898_p4 }
   0xe   :  { %p901_p7 = pnand %p900_p6, %p894_p3 }
  0x10   :  { %904 = shalt.err (!%p901_p7)
}
  0x11   :  { %s956_s19 = smov 128   ;;  %s957_s20 = smov 8  }
  0x12   :  { %25 = dma.hbm_to_vmem [thread:$0]  %s2241_s0, 16384, %s20_s10, [#allocation3], %s956_s19, %s956_s19, %s957_s20  }
  0x13   :  { %s958_s23 = smov [#allocation5]   ;;  %s905_s27 = scalar_lea.hbm %s2242_s1, 16384 }
  0x14   :  { %s35_s24 = sshll.u32 %s958_s23, 4  ;;  %p906_p8 = scmp.ne.s32.totalorder %s2242_s1, %s905_s27  ;;  %s36_s24 = int_to_ptr.vmem [resolvable:$true] %s35_s24 }
  0x15   :  { %p909_p9 = scmp.lt.u32.totalorder %s905_s27, %s2242_s1 }
  0x17   :  { %p911_p10 = pnand %p909_p9, %p906_p8 }
  0x19   :  { %914 = shalt.err (!%p911_p10)
}
  0x1a   :  { %s915_s4 = scalar_lea.vmem %s36_s24, 16384  ;;  %p920_p12 = scmp.lt.s32.totalorder %s36_s24, %s36_s24 }
  0x1b   :  { %p916_p11 = scmp.ne.s32.totalorder %s36_s24, %s915_s4  ;;  %p921_p13 = scmp.lt.s32.totalorder %s915_s4, %s915_s4 }
  0x1d   :  { %p922_p0 = por %p921_p13, %p920_p12 }
  0x1f   :  { %p923_p1 = pnand %p922_p0, %p916_p11 }
  0x21   :  { %926 = shalt.err (!%p923_p1)
}
  0x22   :  { %41 = dma.hbm_to_vmem [thread:$0]  %s2242_s1, 16384, %s36_s24, [#allocation6], %s956_s19, %s956_s19, %s957_s20  }
  0x23   :  { %949 = dma.done.wait [#allocation3], 16384  }
  0x24   :  { %950 = vsyncadd [#allocation3], 4294950912 }
  0x25   :  { %951 = dma.done.wait [#allocation6], 16384  }
  0x26   :  { %952 = vsyncadd [#allocation6], 4294950912  ;;  %v64_v0 = vld [vmem:[#allocation2] sm:$0xff]  ;;  %s959_s1 = smov [#allocation7]  }
  0x27   :  { %v68_v1 = vld [vmem:[#allocation2 + $0x20] sm:$0xff]  ;;  %s864_s6 = sshll.u32 %s959_s1, 4  ;;  %s865_s6 = int_to_ptr.vmem [resolvable:$true] %s864_s6 }
  0x28   :  { %v72_v2 = vld [vmem:[#allocation2 + $0x40] sm:$0xff]  ;;  %s927_s7 = scalar_lea.vmem %s865_s6, 1024  ;;  %p932_p3 = scmp.lt.s32.totalorder %s865_s6, %s865_s6 }
  0x29   :  { %v1005_v3 = vld [vmem:[#allocation2 + $0x60] sm:$0xff]  ;;  %p928_p2 = scmp.ne.s32.totalorder %s865_s6, %s927_s7  ;;  %p933_p4 = scmp.lt.s32.totalorder %s927_s7, %s927_s7 }
  0x2a   :  { %v128_v4 = vld [vmem:[#allocation5] sm:$0xff] }
  0x2b   :  { %v132_v5 = vld [vmem:[#allocation5 + $0x20] sm:$0xff]  ;;  %v192_v8 = vmul.f32 %v128_v4, %v64_v0  ;;  %v316_v45 = vadd.f32 %v128_v4, %v64_v0  ;;  %p934_p5 = por %p933_p4, %p932_p3 }
  0x2c   :  { %v136_v6 = vld [vmem:[#allocation5 + $0x40] sm:$0xff]  ;;  %v196_v9 = vmul.f32 %v132_v5, %v68_v1  ;;  %v320_v46 = vadd.f32 %v132_v5, %v68_v1 }
  0x2d   :  { %v1007_v7 = vld [vmem:[#allocation5 + $0x60] sm:$0xff]  ;;  %v200_v12 = vmul.f32 %v136_v6, %v72_v2  ;;  %v324_v59 = vadd.f32 %v136_v6, %v72_v2  ;;  %p935_p6 = pnand %p934_p5, %p928_p2 }
  0x2e   :  { %v1009_v10 = vld [vmem:[#allocation2 + $0x80] sm:$0xff]  ;;  %v204_v13 = vmul.f32 %v1007_v7, %v1005_v3  ;;  %v256_v14 = vadd.f32 %v196_v9, %v192_v8  ;;  %v328_v6 = vadd.f32 %v1007_v7, %v1005_v3 }
  0x2f   :  { %v1011_v11 = vld [vmem:[#allocation5 + $0x80] sm:$0xff] }
  0x30   :  { %v1015_v15 = vld [vmem:[#allocation2 + $0xa0] sm:$0xff]  ;;  %v208_v17 = vmul.f32 %v1011_v11, %v1009_v10  ;;  %v257_v18 = vadd.f32 %v256_v14, %v200_v12  ;;  %v380_v12 = vadd.f32 %v320_v46, %v316_v45  ;;  %v1121_v7 = vadd.f32 %v1011_v11, %v1009_v10 }
  0x31   :  { %v1017_v16 = vld [vmem:[#allocation5 + $0xa0] sm:$0xff] }
  0x32   :  { %v1021_v19 = vld [vmem:[#allocation2 + $0xc0] sm:$0xff]  ;;  %v212_v22 = vmul.f32 %v1017_v16, %v1015_v15  ;;  %v258_v23 = vadd.f32 %v257_v18, %v204_v13 }
  0x33   :  { %v1023_v20 = vld [vmem:[#allocation5 + $0xc0] sm:$0xff] }
  0x34   :  { %v1025_v21 = vld [vmem:[#allocation2 + $0xe0] sm:$0xff]  ;;  %v216_v29 = vmul.f32 %v1023_v20, %v1021_v19  ;;  %v259_v30 = vadd.f32 %v258_v23, %v208_v17 }
  0x35   :  { %v1029_v24 = vld [vmem:[#allocation2 + $0x100] sm:$0xff] }
  0x36   :  { %v1031_v25 = vld [vmem:[#allocation5 + $0xe0] sm:$0xff]  ;;  %v260_v41 = vadd.f32 %v259_v30, %v212_v22 }
  0x37   :  { %v1033_v26 = vld [vmem:[#allocation5 + $0x100] sm:$0xff]  ;;  %v220_v40 = vmul.f32 %v1031_v25, %v1025_v21 }
  0x38   :  { %v1035_v27 = vld [vmem:[#allocation2 + $0x120] sm:$0xff]  ;;  %v224_v55 = vmul.f32 %v1033_v26, %v1029_v24  ;;  %v261_v56 = vadd.f32 %v260_v41, %v216_v29 }
  0x39   :  { %v1037_v28 = vld [vmem:[#allocation2 + $0x140] sm:$0xff] }
  0x3a   :  { %v1041_v31 = vld [vmem:[#allocation2 + $0x200] sm:$0xff]  ;;  %v262_v8 = vadd.f32 %v261_v56, %v220_v40 }
  0x3b   :  { %v1043_v32 = vld [vmem:[#allocation2 + $0x220] sm:$0xff] }
  0x3c   :  { %v1045_v33 = vld [vmem:[#allocation2 + $0x240] sm:$0xff]  ;;  %v263_v29 = vadd.f32 %v262_v8, %v224_v55 }
  0x3d   :  { %v1047_v34 = vld [vmem:[#allocation2 + $0x160] sm:$0xff] }
  0x3e   :  { %v1049_v35 = vld [vmem:[#allocation5 + $0x120] sm:$0xff] }
  0x3f   :  { %v1051_v36 = vld [vmem:[#allocation5 + $0x140] sm:$0xff]  ;;  %v228_v63 = vmul.f32 %v1049_v35, %v1035_v27 }
  0x40   :  { %v1053_v37 = vld [vmem:[#allocation2 + $0x260] sm:$0xff]  ;;  %v232_v0 = vmul.f32 %v1051_v36, %v1037_v28 }
  0x41   :  { %v1055_v38 = vld [vmem:[#allocation2 + $0x180] sm:$0xff]  ;;  %v264_v10 = vadd.f32 %v263_v29, %v228_v63  ;;  %v1177_v29 = vld [vmem:[#allocation2 + $0x8] sm:$0xff] }
  0x42   :  { %v1057_v39 = vld [vmem:[#allocation2 + $0x1a0] sm:$0xff]  ;;  %2393 = vst [vmem:[#allocation15_spill] sm:$0xff] %v1177_v29 }
  0x43   :  { %v1061_v42 = vld [vmem:[#allocation5 + $0x200] sm:$0xff] }
  0x44   :  { %v1063_v43 = vld [vmem:[#allocation5 + $0x220] sm:$0xff]  ;;  %v578_v51 = vmul.f32 %v1061_v42, %v1041_v31 }
  0x45   :  { %v1065_v44 = vld [vmem:[#allocation5 + $0x240] sm:$0xff]  ;;  %v582_v52 = vmul.f32 %v1063_v43, %v1043_v32 }
  0x46   :  { %v1067_v47 = vld [vmem:[#allocation2 + $0x1c0] sm:$0xff]  ;;  %v586_v53 = vmul.f32 %v1065_v44, %v1045_v33 }
  0x47   :  { %v1069_v48 = vld [vmem:[#allocation5 + $0x160] sm:$0xff]  ;;  %v642_v4 = vadd.f32 %v582_v52, %v578_v51  ;;  %v1133_v52 = vadd.f32 %v1017_v16, %v1015_v15  ;;  %v381_v15 = vadd.f32 %v380_v12, %v324_v59 }
  0x48   :  { %v1071_v49 = vld [vmem:[#allocation5 + $0x180] sm:$0xff]  ;;  %v236_v5 = vmul.f32 %v1069_v48, %v1047_v34 }
  0x49   :  { %v1073_v50 = vld [vmem:[#allocation5 + $0x260] sm:$0xff]  ;;  %v1103_v13 = vmul.f32 %v1071_v49, %v1055_v38  ;;  %v643_v18 = vadd.f32 %v642_v4, %v586_v53  ;;  %v1137_v53 = vadd.f32 %v1023_v20, %v1021_v19  ;;  %v1147_v4 = vadd.f32 %v1031_v25, %v1025_v21 }
  0x4a   :  { %v180_v54 = vld [vmem:[#allocation5 + $0x1a0] sm:$0xff]  ;;  %v590_v1 = vmul.f32 %v1073_v50, %v1053_v37  ;;  %v1167_v25 = vadd.f32 %v1049_v35, %v1035_v27  ;;  %v1189_v27 = vadd.f32 %v1071_v49, %v1055_v38 }
  0x4b   :  { %v1083_v57 = vld [vmem:[#allocation2 + $0x280] sm:$0xff]  ;;  %v1106_v14 = vmul.f32 %v180_v54, %v1057_v39 }
  0x4c   :  { %v1085_v58 = vld [vmem:[#allocation5 + $0x280] sm:$0xff]  ;;  %v644_v51 = vadd.f32 %v643_v18, %v590_v1  ;;  %v1151_v1 = vadd.f32 %v1033_v26, %v1029_v24  ;;  %2391 = vst [vmem:[#allocation13_spill] sm:$0xff] %v1167_v25  ;;  %v1171_v24 = vadd.f32 %v1051_v36, %v1037_v28  ;;  %v265_v26 = vadd.f32 %v264_v10, %v232_v0  ;;  %v1200_v10 = vld [vmem:[#allocation5 + $0x28] sm:$0xff] }
  0x4d   :  { %v124_v60 = vld [vmem:[#allocation2 + $0x1e0] sm:$0xff]  ;;  %v594_v17 = vmul.f32 %v1085_v58, %v1083_v57  ;;  %2397 = vst [vmem:[#allocation19_spill] sm:$0xff] %v1189_v27  ;;  %v1192_v28 = vadd.f32 %v180_v54, %v1057_v39  ;;  %2399 = vst [vmem:[#allocation21_spill] sm:$0xff] %v1200_v10 }
  0x4e   :  { %v184_v61 = vld [vmem:[#allocation5 + $0x1c0] sm:$0xff]  ;;  %2390 = vst [vmem:[#allocation12_spill] sm:$0xff] %v1151_v1  ;;  %2392 = vst [vmem:[#allocation14_spill] sm:$0xff] %v1171_v24  ;;  %v1179_v1 = vld [vmem:[#allocation2 + $0x28] sm:$0xff] }
  0x4f   :  { %v188_v62 = vld [vmem:[#allocation5 + $0x1e0] sm:$0xff]  ;;  %v1111_v22 = vmul.f32 %v184_v61, %v1067_v47  ;;  %v645_v21 = vadd.f32 %v644_v51, %v594_v17  ;;  %2394 = vst [vmem:[#allocation16_spill] sm:$0xff] %v1179_v1  ;;  %v1185_v17 = vadd.f32 %v1069_v48, %v1047_v34  ;;  %2398 = vst [vmem:[#allocation20_spill] sm:$0xff] %v1192_v28  ;;  %v1215_v28 = vld [vmem:[#allocation2 + $0x48] sm:$0xff] }
  0x50   :  { %v1095_v9 = vld [vmem:[#allocation2 + $0x2a0] sm:$0xff]  ;;  %v1113_v23 = vmul.f32 %v188_v62, %v124_v60  ;;  %v1203_v34 = vadd.f32 %v184_v61, %v1067_v47  ;;  %v1205_v48 = vadd.f32 %v188_v62, %v124_v60  ;;  %2402 = vst [vmem:[#allocation24_spill] sm:$0xff] %v1215_v28  ;;  %v266_v47 = vadd.f32 %v265_v26, %v236_v5  ;;  %v1235_v5 = vld [vmem:[#allocation5 + $0x68] sm:$0xff] }
  0x51   :  { %v1097_v2 = vld [vmem:[#allocation5 + $0x2a0] sm:$0xff]  ;;  %2396 = vst [vmem:[#allocation18_spill] sm:$0xff] %v1185_v17 }
  0x52   :  { %2389 = vst [vmem:[#allocation11_spill] sm:$0xff] %v1113_v23  ;;  %v1115_v30 = vld [vmem:[#allocation2 + $0x2c0] sm:$0xff]  ;;  %v598_v46 = vmul.f32 %v1097_v2, %v1095_v9  ;;  %v1181_v23 = vld [vmem:[#allocation5 + $0x8] sm:$0xff]  ;;  %2400 = vst [vmem:[#allocation22_spill] sm:$0xff] %v1203_v34  ;;  %v197_v34 = vmul.f32 %v1200_v10, %v1179_v1  ;;  %v1264_v1 = vadd.f32 %v1073_v50, %v1053_v37 }
  0x53   :  { %v1117_v3 = vld [vmem:[#allocation5 + $0x2c0] sm:$0xff]  ;;  %2395 = vst [vmem:[#allocation17_spill] sm:$0xff] %v1181_v23  ;;  %2401 = vst [vmem:[#allocation23_spill] sm:$0xff] %v1205_v48  ;;  %v193_v48 = vmul.f32 %v1181_v23, %v1177_v29  ;;  %v1281_v37 = vadd.f32 %v1085_v58, %v1083_v57 }
  0x54   :  { %v1123_v40 = vld [vmem:[#allocation2 + $0x2e0] sm:$0xff]  ;;  %v602_v18 = vmul.f32 %v1117_v3, %v1115_v30  ;;  %v646_v51 = vadd.f32 %v645_v21, %v598_v46  ;;  %v1217_v46 = vld [vmem:[#allocation5 + $0x48] sm:$0xff]  ;;  %v382_v21 = vadd.f32 %v381_v15, %v328_v6  ;;  %v702_v15 = vadd.f32 %v1061_v42, %v1041_v31 }
  0x55   :  { %v1125_v41 = vld [vmem:[#allocation2 + $0x300] sm:$0xff]  ;;  %2403 = vst [vmem:[#allocation25_spill] sm:$0xff] %v1217_v46  ;;  %v1233_v6 = vld [vmem:[#allocation2 + $0x68] sm:$0xff]  ;;  %v201_v25 = vmul.f32 %v1217_v46, %v1215_v28  ;;  %v271_v29 = vadd.f32 %v197_v34, %v193_v48  ;;  %v1289_v50 = vadd.f32 %v1117_v3, %v1115_v30 }
  0x56   :  { %v1127_v45 = vld [vmem:[#allocation2 + $0x320] sm:$0xff]  ;;  %v647_v62 = vadd.f32 %v646_v51, %v602_v18  ;;  %v706_v18 = vadd.f32 %v1063_v43, %v1043_v32  ;;  %v1255_v31 = vld [vmem:[#allocation2 + $0x88] sm:$0xff]  ;;  %v383_v32 = vadd.f32 %v382_v21, %v1121_v7  ;;  %v710_v43 = vadd.f32 %v1065_v44, %v1045_v33 }
  0x57   :  { %v1139_v11 = vld [vmem:[#allocation2 + $0x340] sm:$0xff]  ;;  %v1257_v42 = vld [vmem:[#allocation5 + $0x88] sm:$0xff]  ;;  %v205_v23 = vmul.f32 %v1235_v5, %v1233_v6  ;;  %v1285_v44 = vadd.f32 %v1097_v2, %v1095_v9  ;;  %v272_v58 = vadd.f32 %v271_v29, %v201_v25 }
  0x58   :  { %v1141_v55 = vld [vmem:[#allocation5 + $0x2e0] sm:$0xff]  ;;  %v1267_v46 = vld [vmem:[#allocation2 + $0xa8] sm:$0xff]  ;;  %v209_v57 = vmul.f32 %v1257_v42, %v1255_v31  ;;  %v384_v21 = vadd.f32 %v383_v32, %v1133_v52 }
  0x59   :  { %v1143_v56 = vld [vmem:[#allocation5 + $0x300] sm:$0xff]  ;;  %v606_v0 = vmul.f32 %v1141_v55, %v1123_v40  ;;  %v1269_v28 = vld [vmem:[#allocation2 + $0xc8] sm:$0xff]  ;;  %v1301_v9 = vadd.f32 %v1141_v55, %v1123_v40 }
  0x5a   :  { %v1153_v16 = vld [vmem:[#allocation2 + $0x360] sm:$0xff]  ;;  %v610_v39 = vmul.f32 %v1143_v56, %v1125_v41  ;;  %v1275_v7 = vld [vmem:[#allocation2 + $0x108] sm:$0xff] }
  0x5b   :  { %v1155_v19 = vld [vmem:[#allocation2 + $0x380] sm:$0xff]  ;;  %v648_v24 = vadd.f32 %v647_v62, %v606_v0  ;;  %v267_v0 = vadd.f32 %v266_v47, %v1103_v13  ;;  %v1277_v33 = vld [vmem:[#allocation5 + $0xa8] sm:$0xff]  ;;  %v766_v13 = vadd.f32 %v706_v18, %v702_v15  ;;  %2407 = vst [vmem:[#allocation29_spill] sm:$0xff] %v1301_v9  ;;  %v1314_v47 = vadd.f32 %v1143_v56, %v1125_v41 }
  0x5c   :  { %v1157_v20 = vld [vmem:[#allocation5 + $0x320] sm:$0xff]  ;;  %v1291_v34 = vld [vmem:[#allocation2 + $0x128] sm:$0xff]  ;;  %v213_v52 = vmul.f32 %v1277_v33, %v1267_v46  ;;  %v273_v41 = vadd.f32 %v272_v58, %v205_v23 }
  0x5d   :  { %v1159_v63 = vld [vmem:[#allocation5 + $0x340] sm:$0xff]  ;;  %v614_v49 = vmul.f32 %v1157_v20, %v1127_v45  ;;  %v649_v62 = vadd.f32 %v648_v24, %v610_v39  ;;  %2405 = vst [vmem:[#allocation27_spill] sm:$0xff] %v1291_v34  ;;  %v1293_v48 = vld [vmem:[#allocation5 + $0xc8] sm:$0xff]  ;;  %2410 = vst [vmem:[#allocation32_spill] sm:$0xff] %v1314_v47  ;;  %v1318_v25 = vadd.f32 %v1157_v20, %v1127_v45 }
  0x5e   :  { %v1161_v8 = vld [vmem:[#allocation5 + $0x360] sm:$0xff]  ;;  %v618_v54 = vmul.f32 %v1159_v63, %v1139_v11  ;;  %2406 = vst [vmem:[#allocation28_spill] sm:$0xff] %v1293_v48  ;;  %v1295_v39 = vld [vmem:[#allocation5 + $0xe8] sm:$0xff]  ;;  %v1322_v40 = vadd.f32 %v1159_v63, %v1139_v11  ;;  %v268_v55 = vadd.f32 %v267_v0, %v1106_v14  ;;  %v274_v47 = vadd.f32 %v273_v41, %v209_v57 }
  0x5f   :  { %v1173_v59 = vld [vmem:[#allocation2 + $0x3a0] sm:$0xff]  ;;  %v622_v27 = vmul.f32 %v1161_v8, %v1153_v16  ;;  %v650_v24 = vadd.f32 %v649_v62, %v614_v49  ;;  %v1303_v2 = vld [vmem:[#allocation2 + $0x148] sm:$0xff]  ;;  %2411 = vst [vmem:[#allocation33_spill] sm:$0xff] %v1318_v25  ;;  %v1349_v23 = vadd.f32 %v1161_v8, %v1153_v16  ;;  %v767_v62 = vadd.f32 %v766_v13, %v710_v43 }
  0x60   :  { %v1175_v12 = vld [vmem:[#allocation2 + $0x3c0] sm:$0xff]  ;;  %v1305_v30 = vld [vmem:[#allocation5 + $0x108] sm:$0xff]  ;;  %2412 = vst [vmem:[#allocation34_spill] sm:$0xff] %v1322_v40  ;;  %v385_v13 = vadd.f32 %v384_v21, %v1137_v53  ;;  %v269_v57 = vadd.f32 %v268_v55, %v1111_v22 }
  0x61   :  { %v1194_v35 = vld [vmem:[#allocation5 + $0x380] sm:$0xff]  ;;  %v1307_v3 = vld [vmem:[#allocation5 + $0x128] sm:$0xff]  ;;  %v651_v29 = vadd.f32 %v650_v24, %v618_v54  ;;  %v217_v54 = vmul.f32 %v1293_v48, %v1269_v28  ;;  %2416 = vst [vmem:[#allocation38_spill] sm:$0xff] %v1349_v23  ;;  %v225_v25 = vmul.f32 %v1305_v30, %v1275_v7  ;;  %v275_v23 = vadd.f32 %v274_v47, %v213_v52 }
  0x62   :  { %v1196_v36 = vld [vmem:[#allocation5 + $0x3a0] sm:$0xff]  ;;  %v1231_v17 = vmul.f32 %v1194_v35, %v1155_v19  ;;  %2408 = vst [vmem:[#allocation30_spill] sm:$0xff] %v1307_v3  ;;  %v1309_v49 = vld [vmem:[#allocation2 + $0x208] sm:$0xff]  ;;  %v1353_v0 = vadd.f32 %v1194_v35, %v1155_v19 }
  0x63   :  { %v1207_v38 = vld [vmem:[#allocation5 + $0x3c0] sm:$0xff]  ;;  %v1243_v26 = vmul.f32 %v1196_v36, %v1173_v59  ;;  %2409 = vst [vmem:[#allocation31_spill] sm:$0xff] %v1309_v49  ;;  %v1325_v15 = vld [vmem:[#allocation2 + $0x168] sm:$0xff]  ;;  %v652_v24 = vadd.f32 %v651_v29, %v622_v27  ;;  %v229_v27 = vmul.f32 %v1307_v3, %v1291_v34  ;;  %v276_v52 = vadd.f32 %v275_v23, %v217_v54 }
  0x64   :  { %v1219_v61 = vld [vmem:[#allocation2 + $0x3e0] sm:$0xff]  ;;  %v1247_v51 = vmul.f32 %v1207_v38, %v1175_v12  ;;  %v1327_v18 = vld [vmem:[#allocation2 + $0x188] sm:$0xff]  ;;  %2417 = vst [vmem:[#allocation39_spill] sm:$0xff] %v1353_v0 }
  0x65   :  { %v1221_v60 = vld [vmem:[#allocation5 + $0x3e0] sm:$0xff]  ;;  %v1331_v56 = vld [vmem:[#allocation2 + $0x228] sm:$0xff]  ;;  %v653_v29 = vadd.f32 %v652_v24, %v1231_v17  ;;  %v768_v17 = vadd.f32 %v767_v62, %v1264_v1  ;;  %v386_v62 = vadd.f32 %v385_v13, %v1147_v4  ;;  %v1437_v4 = vadd.f32 %v1207_v38, %v1175_v12  ;;  %v2441_v38 = vld [vmem:[#allocation17_spill] sm:$0xff] }
  0x66   :  { %2404 = vst [vmem:[#allocation26_spill] sm:$0xff] %v1221_v60  ;;  %v1253_v10 = vmul.f32 %v1221_v60, %v1219_v61  ;;  %v1273_v60 = vld [vmem:[#allocation2 + $0xe8] sm:$0xff]  ;;  %2413 = vst [vmem:[#allocation35_spill] sm:$0xff] %v1331_v56  ;;  %v2440_v12 = vld [vmem:[#allocation15_spill] sm:$0xff] }
  0x67   :  { %v1333_v32 = vld [vmem:[#allocation5 + $0x208] sm:$0xff]  ;;  %v221_v40 = vmul.f32 %v1295_v39, %v1273_v60  ;;  %v654_v21 = vadd.f32 %v653_v29, %v1243_v26  ;;  %v2427_v29 = vld [vmem:[#allocation11_spill] sm:$0xff]  ;;  %2432 = vst [vmem:[#allocation52_spill] sm:$0xff] %v1437_v4  ;;  %v1469_v4 = vld [vmem:[#allocation5 + $0x10] sm:$0xff] }
  0x68   :  { %2414 = vst [vmem:[#allocation36_spill] sm:$0xff] %v1333_v32  ;;  %v1335_v45 = vld [vmem:[#allocation5 + $0x228] sm:$0xff]  ;;  %v579_v35 = vmul.f32 %v1333_v32, %v1309_v49  ;;  %2445 = vst [vmem:[#allocation59_spill] sm:$0xff] %v1469_v4 }
  0x69   :  { %2415 = vst [vmem:[#allocation37_spill] sm:$0xff] %v1335_v45  ;;  %v1337_v20 = vld [vmem:[#allocation2 + $0x1a8] sm:$0xff]  ;;  %v583_v43 = vmul.f32 %v1335_v45, %v1331_v56  ;;  %v655_v32 = vadd.f32 %v654_v21, %v1247_v51  ;;  %v277_v49 = vadd.f32 %v276_v52, %v221_v40  ;;  %v769_v51 = vadd.f32 %v768_v17, %v1281_v37  ;;  %v1449_v52 = vld [vmem:[#allocation2 + $0x10] sm:$0xff] }
  0x6a   :  { %v1339_v11 = vld [vmem:[#allocation2 + $0x1c8] sm:$0xff]  ;;  %2437 = vst [vmem:[#allocation57_spill] sm:$0xff] %v1449_v52  ;;  %v1457_v37 = vadd.f32 %v2441_v38, %v2440_v12  ;;  %v2449_v38 = vld [vmem:[#allocation21_spill] sm:$0xff] }
  0x6b   :  { %v1341_v14 = vld [vmem:[#allocation5 + $0x148] sm:$0xff]  ;;  %v657_v26 = vadd.f32 %v583_v43, %v579_v35  ;;  %v656_v40 = vadd.f32 %v655_v32, %v1253_v10  ;;  %v278_v13 = vadd.f32 %v277_v49, %v225_v25 }
  0x6c   :  { %v1343_v63 = vld [vmem:[#allocation5 + $0x168] sm:$0xff]  ;;  %v1384_v0 = vmul.f32 %v1341_v14, %v1303_v2 }
  0x6d   :  { %v1355_v58 = vld [vmem:[#allocation5 + $0x188] sm:$0xff]  ;;  %v1392_v45 = vmul.f32 %v1343_v63, %v1325_v15 }
  0x6e   :  { %v1361_v9 = vld [vmem:[#allocation2 + $0x248] sm:$0xff]  ;;  %v1396_v22 = vmul.f32 %v1355_v58, %v1327_v18 }
  0x6f   :  { %2418 = vst [vmem:[#allocation40_spill] sm:$0xff] %v1361_v9  ;;  %v1363_v48 = vld [vmem:[#allocation5 + $0x248] sm:$0xff] }
  0x70   :  { %2419 = vst [vmem:[#allocation41_spill] sm:$0xff] %v1363_v48  ;;  %v1365_v16 = vld [vmem:[#allocation2 + $0x1e8] sm:$0xff]  ;;  %v587_v53 = vmul.f32 %v1363_v48, %v1361_v9  ;;  %v270_v9 = vadd.f32 %v269_v57, %v2427_v29  ;;  %v1467_v29 = vld [vmem:[#allocation2 + $0x30] sm:$0xff] }
  0x71   :  { %2420 = vst [vmem:[#allocation42_spill] sm:$0xff] %v1365_v16  ;;  %v1367_v8 = vld [vmem:[#allocation5 + $0x1a8] sm:$0xff] }
  0x72   :  { %v1369_v19 = vld [vmem:[#allocation5 + $0x1c8] sm:$0xff]  ;;  %v1404_v47 = vmul.f32 %v1367_v8, %v1337_v20  ;;  %v658_v43 = vadd.f32 %v657_v26, %v587_v53  ;;  %v2438_v53 = vld [vmem:[#allocation26_spill] sm:$0xff] }
  0x73   :  { %2421 = vst [vmem:[#allocation43_spill] sm:$0xff] %v1369_v19  ;;  %v1380_v41 = vld [vmem:[#allocation5 + $0x1e8] sm:$0xff]  ;;  %v1408_v55 = vmul.f32 %v1369_v19, %v1339_v11  ;;  %v1429_v19 = vadd.f32 %v1196_v36, %v1173_v59  ;;  %v1453_v26 = vadd.f32 %v2438_v53, %v1219_v61  ;;  %v1471_v61 = vld [vmem:[#allocation5 + $0x30] sm:$0xff] }
  0x74   :  { %2422 = vst [vmem:[#allocation44_spill] sm:$0xff] %v1380_v41  ;;  %v1386_v3 = vld [vmem:[#allocation2 + $0x268] sm:$0xff]  ;;  %v1416_v48 = vmul.f32 %v1380_v41, %v1365_v16  ;;  %2446 = vst [vmem:[#allocation60_spill] sm:$0xff] %v1471_v61 }
  0x75   :  { %2423 = vst [vmem:[#allocation45_spill] sm:$0xff] %v1386_v3  ;;  %v1388_v34 = vld [vmem:[#allocation5 + $0x268] sm:$0xff]  ;;  %2430 = vst [vmem:[#allocation50_spill] sm:$0xff] %v1429_v19  ;;  %v279_v19 = vadd.f32 %v278_v13, %v229_v27  ;;  %v1500_v13 = vld [vmem:[#allocation2 + $0x50] sm:$0xff] }
  0x76   :  { %2424 = vst [vmem:[#allocation46_spill] sm:$0xff] %v1388_v34  ;;  %v1410_v24 = vld [vmem:[#allocation2 + $0x288] sm:$0xff]  ;;  %v591_v1 = vmul.f32 %v1388_v34, %v1386_v3  ;;  %2439 = vst [vmem:[#allocation26_spill] sm:$0xff] %v1453_v26 }
  0x77   :  { %2425 = vst [vmem:[#allocation47_spill] sm:$0xff] %v1410_v24  ;;  %v1412_v56 = vld [vmem:[#allocation5 + $0x288] sm:$0xff]  ;;  %2459 = vst [vmem:[#allocation63_spill] sm:$0xff] %v1500_v13 }
  0x78   :  { %2426 = vst [vmem:[#allocation48_spill] sm:$0xff] %v1412_v56  ;;  %v1423_v54 = vld [vmem:[#allocation2 + $0x2a8] sm:$0xff]  ;;  %v595_v35 = vmul.f32 %v1412_v56, %v1410_v24  ;;  %v659_v17 = vadd.f32 %v658_v43, %v591_v1  ;;  %v826_v24 = vadd.f32 %v656_v40, %v270_v9 }
  0x79   :  { %2428 = vst [vmem:[#allocation11_spill] sm:$0xff] %v1423_v54  ;;  %v1425_v23 = vld [vmem:[#allocation5 + $0x2a8] sm:$0xff] }
  0x7a   :  { %2429 = vst [vmem:[#allocation49_spill] sm:$0xff] %v1425_v23  ;;  %v1431_v41 = vld [vmem:[#allocation2 + $0x2c8] sm:$0xff]  ;;  %v599_v32 = vmul.f32 %v1425_v23, %v1423_v54  ;;  %v2455_v54 = vld [vmem:[#allocation25_spill] sm:$0xff]  ;;  %v660_v40 = vadd.f32 %v659_v17, %v595_v35  ;;  %v194_v35 = vmul.f32 %v1469_v4, %v1449_v52  ;;  %v198_v17 = vmul.f32 %v1471_v61, %v1467_v29 }
  0x7b   :  { %2431 = vst [vmem:[#allocation51_spill] sm:$0xff] %v1431_v41  ;;  %v1441_v57 = vld [vmem:[#allocation2 + $0x2e8] sm:$0xff]  ;;  %842 = vst [vmem:[#allocation7] sm:$0xff] %v826_v24 }
  0x7c   :  { %2433 = vst [vmem:[#allocation53_spill] sm:$0xff] %v1441_v57  ;;  %v1443_v21 = vld [vmem:[#allocation2 + $0x308] sm:$0xff] }
  0x7d   :  { %2434 = vst [vmem:[#allocation54_spill] sm:$0xff] %v1443_v21  ;;  %v1445_v59 = vld [vmem:[#allocation5 + $0x2c8] sm:$0xff] }
  0x7e   :  { %2435 = vst [vmem:[#allocation55_spill] sm:$0xff] %v1445_v59  ;;  %v1447_v36 = vld [vmem:[#allocation5 + $0x2e8] sm:$0xff]  ;;  %v603_v27 = vmul.f32 %v1445_v59, %v1431_v41 }
  0x7f   :  { %2436 = vst [vmem:[#allocation56_spill] sm:$0xff] %v1447_v36  ;;  %v1459_v10 = vld [vmem:[#allocation2 + $0x328] sm:$0xff] }
  0x80   :  { %2442 = vst [vmem:[#allocation15_spill] sm:$0xff] %v1459_v10  ;;  %v1461_v49 = vld [vmem:[#allocation2 + $0x348] sm:$0xff] }
  0x81   :  { %2443 = vst [vmem:[#allocation17_spill] sm:$0xff] %v1461_v49  ;;  %v1463_v25 = vld [vmem:[#allocation2 + $0x368] sm:$0xff] }
  0x82   :  { %2444 = vst [vmem:[#allocation58_spill] sm:$0xff] %v1463_v25  ;;  %v2447_v53 = vld [vmem:[#allocation12_spill] sm:$0xff] }
  0x83   :  { %v387_v26 = vadd.f32 %v386_v62, %v2447_v53  ;;  %v2448_v12 = vld [vmem:[#allocation16_spill] sm:$0xff]  ;;  %v1492_v62 = vadd.f32 %v1235_v5, %v1233_v6  ;;  %v280_v6 = vadd.f32 %v279_v19, %v1384_v0  ;;  %v1526_v0 = vld [vmem:[#allocation2 + $0x70] sm:$0xff] }
  0x84   :  { %v1476_v56 = vadd.f32 %v2449_v38, %v2448_v12  ;;  %v1478_v34 = vld [vmem:[#allocation2 + $0x388] sm:$0xff]  ;;  %v1502_v12 = vld [vmem:[#allocation5 + $0x50] sm:$0xff]  ;;  %v770_v38 = vadd.f32 %v769_v51, %v1285_v44  ;;  %v661_v44 = vadd.f32 %v660_v40, %v599_v32  ;;  %2465 = vst [vmem:[#allocation69_spill] sm:$0xff] %v1526_v0 }
  0x85   :  { %2450 = vst [vmem:[#allocation12_spill] sm:$0xff] %v1478_v34  ;;  %v1480_v3 = vld [vmem:[#allocation5 + $0x308] sm:$0xff]  ;;  %2460 = vst [vmem:[#allocation64_spill] sm:$0xff] %v1502_v12  ;;  %v1528_v19 = vld [vmem:[#allocation5 + $0x70] sm:$0xff]  ;;  %v202_v40 = vmul.f32 %v1502_v12, %v1500_v13  ;;  %v281_v24 = vadd.f32 %v280_v6, %v1392_v45 }
  0x86   :  { %2451 = vst [vmem:[#allocation16_spill] sm:$0xff] %v1480_v3  ;;  %v1482_v23 = vld [vmem:[#allocation5 + $0x328] sm:$0xff]  ;;  %2466 = vst [vmem:[#allocation70_spill] sm:$0xff] %v1528_v19  ;;  %v2467_v51 = vld [vmem:[#allocation13_spill] sm:$0xff]  ;;  %v206_v6 = vmul.f32 %v1528_v19, %v1526_v0 }
  0x87   :  { %2452 = vst [vmem:[#allocation21_spill] sm:$0xff] %v1482_v23  ;;  %v1484_v1 = vld [vmem:[#allocation5 + $0x348] sm:$0xff]  ;;  %v388_v41 = vadd.f32 %v387_v26, %v2467_v51  ;;  %v615_v61 = vmul.f32 %v1482_v23, %v1459_v10  ;;  %v662_v51 = vadd.f32 %v661_v44, %v603_v27  ;;  %v1554_v23 = vld [vmem:[#allocation5 + $0x90] sm:$0xff]  ;;  %v286_v27 = vadd.f32 %v198_v17, %v194_v35 }
  0x88   :  { %2453 = vst [vmem:[#allocation61_spill] sm:$0xff] %v1484_v1  ;;  %v2454_v43 = vld [vmem:[#allocation24_spill] sm:$0xff]  ;;  %2471 = vst [vmem:[#allocation73_spill] sm:$0xff] %v1554_v23  ;;  %v1565_v45 = vld [vmem:[#allocation2 + $0xb0] sm:$0xff] }
  0x89   :  { %v1488_v16 = vadd.f32 %v2455_v54, %v2454_v43  ;;  %2456 = vst [vmem:[#allocation24_spill] sm:$0xff] %v1492_v62  ;;  %v1494_v53 = vld [vmem:[#allocation2 + $0x3a8] sm:$0xff]  ;;  %v1507_v54 = vadd.f32 %v1257_v42, %v1255_v31  ;;  %v607_v31 = vmul.f32 %v1447_v36, %v1441_v57  ;;  %v611_v42 = vmul.f32 %v1480_v3, %v1443_v21  ;;  %v1552_v3 = vld [vmem:[#allocation2 + $0x90] sm:$0xff] }
  0x8a   :  { %2457 = vst [vmem:[#allocation25_spill] sm:$0xff] %v1494_v53  ;;  %v1496_v9 = vld [vmem:[#allocation5 + $0x368] sm:$0xff]  ;;  %v1539_v36 = vmul.f32 %v1484_v1, %v1461_v49  ;;  %2470 = vst [vmem:[#allocation72_spill] sm:$0xff] %v1552_v3  ;;  %v771_v1 = vadd.f32 %v770_v38, %v1289_v50  ;;  %v1573_v50 = vld [vmem:[#allocation2 + $0xd0] sm:$0xff] }
  0x8b   :  { %2458 = vst [vmem:[#allocation62_spill] sm:$0xff] %v1496_v9  ;;  %v1510_v5 = vld [vmem:[#allocation2 + $0x3c8] sm:$0xff]  ;;  %v1543_v32 = vmul.f32 %v1496_v9, %v1463_v25  ;;  %2472 = vst [vmem:[#allocation74_spill] sm:$0xff] %v1565_v45  ;;  %v1575_v38 = vld [vmem:[#allocation2 + $0xf0] sm:$0xff] }
  0x8c   :  { %2461 = vst [vmem:[#allocation65_spill] sm:$0xff] %v1510_v5  ;;  %v1512_v43 = vld [vmem:[#allocation5 + $0x388] sm:$0xff]  ;;  %2473 = vst [vmem:[#allocation75_spill] sm:$0xff] %v1573_v50  ;;  %v1586_v35 = vld [vmem:[#allocation5 + $0xd0] sm:$0xff] }
  0x8d   :  { %2462 = vst [vmem:[#allocation66_spill] sm:$0xff] %v1512_v43  ;;  %v1514_v62 = vld [vmem:[#allocation5 + $0x3a8] sm:$0xff]  ;;  %v1550_v26 = vmul.f32 %v1512_v43, %v1478_v34  ;;  %v663_v43 = vadd.f32 %v662_v51, %v607_v31  ;;  %2474 = vst [vmem:[#allocation76_spill] sm:$0xff] %v1575_v38  ;;  %v1584_v34 = vld [vmem:[#allocation2 + $0x110] sm:$0xff]  ;;  %v210_v31 = vmul.f32 %v1554_v23, %v1552_v3 }
  0x8e   :  { %2463 = vst [vmem:[#allocation67_spill] sm:$0xff] %v1514_v62  ;;  %v1520_v59 = vld [vmem:[#allocation5 + $0x3c8] sm:$0xff]  ;;  %v1559_v9 = vmul.f32 %v1514_v62, %v1494_v53  ;;  %v1577_v62 = vld [vmem:[#allocation5 + $0xb0] sm:$0xff]  ;;  %v2476_v53 = vld [vmem:[#allocation14_spill] sm:$0xff]  ;;  %v287_v51 = vadd.f32 %v286_v27, %v202_v40  ;;  %v218_v21 = vmul.f32 %v1586_v35, %v1573_v50 }
  0x8f   :  { %2464 = vst [vmem:[#allocation68_spill] sm:$0xff] %v1520_v59  ;;  %v1531_v4 = vld [vmem:[#allocation2 + $0x3e8] sm:$0xff]  ;;  %v1563_v25 = vmul.f32 %v1520_v59, %v1510_v5  ;;  %2475 = vst [vmem:[#allocation77_spill] sm:$0xff] %v1577_v62  ;;  %v389_v59 = vadd.f32 %v388_v41, %v2476_v53  ;;  %v1582_v5 = vadd.f32 %v1277_v33, %v1267_v46  ;;  %v1588_v17 = vld [vmem:[#allocation5 + $0xf0] sm:$0xff] }
  0x90   :  { %2468 = vst [vmem:[#allocation13_spill] sm:$0xff] %v1531_v4  ;;  %v1533_v52 = vld [vmem:[#allocation5 + $0x3e8] sm:$0xff]  ;;  %2477 = vst [vmem:[#allocation14_spill] sm:$0xff] %v1584_v34  ;;  %v1598_v41 = vadd.f32 %v1295_v39, %v1273_v60  ;;  %v282_v46 = vadd.f32 %v281_v24, %v1396_v22  ;;  %v664_v33 = vadd.f32 %v663_v43, %v611_v42  ;;  %v1601_v53 = vld [vmem:[#allocation2 + $0x130] sm:$0xff] }
  0x91   :  { %2469 = vst [vmem:[#allocation71_spill] sm:$0xff] %v1533_v52  ;;  %v1571_v44 = vmul.f32 %v1533_v52, %v1531_v4  ;;  %2478 = vst [vmem:[#allocation78_spill] sm:$0xff] %v1586_v35  ;;  %v2480_v52 = vld [vmem:[#allocation28_spill] sm:$0xff]  ;;  %v1603_v19 = vld [vmem:[#allocation2 + $0x150] sm:$0xff]  ;;  %v214_v24 = vmul.f32 %v1577_v62, %v1565_v45  ;;  %v288_v23 = vadd.f32 %v287_v51, %v206_v6 }
  0x92   :  { %2479 = vst [vmem:[#allocation79_spill] sm:$0xff] %v1588_v17  ;;  %v1594_v4 = vadd.f32 %v2480_v52, %v1269_v28  ;;  %2481 = vst [vmem:[#allocation28_spill] sm:$0xff] %v1601_v53  ;;  %v1605_v0 = vld [vmem:[#allocation2 + $0x210] sm:$0xff]  ;;  %v1614_v52 = vadd.f32 %v1305_v30, %v1275_v7  ;;  %v1636_v30 = vadd.f32 %v1341_v14, %v1303_v2  ;;  %v2494_v51 = vld [vmem:[#allocation18_spill] sm:$0xff] }
  0x93   :  { %2482 = vst [vmem:[#allocation80_spill] sm:$0xff] %v1603_v19  ;;  %v1607_v12 = vld [vmem:[#allocation2 + $0x230] sm:$0xff]  ;;  %v665_v13 = vadd.f32 %v664_v33, %v615_v61  ;;  %v390_v45 = vadd.f32 %v389_v59, %v2494_v51  ;;  %v222_v33 = vmul.f32 %v1588_v17, %v1575_v38  ;;  %v283_v51 = vadd.f32 %v282_v46, %v1404_v47 }
  0x94   :  { %v1609_v40 = vld [vmem:[#allocation5 + $0x210] sm:$0xff] }
  0x95   :  { %v2483_v27 = vld [vmem:[#allocation29_spill] sm:$0xff]  ;;  %v580_v35 = vmul.f32 %v1609_v40, %v1605_v0 }
  0x96   :  { %v772_v28 = vadd.f32 %v771_v1, %v2483_v27  ;;  %v1616_v60 = vld [vmem:[#allocation2 + $0x170] sm:$0xff]  ;;  %v2489_v1 = vld [vmem:[#allocation27_spill] sm:$0xff]  ;;  %v2490_v27 = vld [vmem:[#allocation30_spill] sm:$0xff] }
  0x97   :  { %2484 = vst [vmem:[#allocation29_spill] sm:$0xff] %v1616_v60  ;;  %v1618_v39 = vld [vmem:[#allocation2 + $0x190] sm:$0xff]  ;;  %v1632_v7 = vadd.f32 %v2490_v27, %v2489_v1  ;;  %v1651_v1 = vadd.f32 %v1343_v63, %v1325_v15  ;;  %v289_v27 = vadd.f32 %v288_v23, %v210_v31  ;;  %v666_v15 = vadd.f32 %v665_v13, %v1539_v36  ;;  %v2500_v23 = vld [vmem:[#allocation32_spill] sm:$0xff] }
  0x98   :  { %2485 = vst [vmem:[#allocation81_spill] sm:$0xff] %v1618_v39  ;;  %v1620_v22 = vld [vmem:[#allocation2 + $0x1b0] sm:$0xff]  ;;  %v773_v31 = vadd.f32 %v772_v28, %v2500_v23 }
  0x99   :  { %2486 = vst [vmem:[#allocation82_spill] sm:$0xff] %v1620_v22  ;;  %v1622_v43 = vld [vmem:[#allocation5 + $0x110] sm:$0xff]  ;;  %2495 = vst [vmem:[#allocation18_spill] sm:$0xff] %v1651_v1  ;;  %v290_v47 = vadd.f32 %v289_v27, %v214_v24  ;;  %v667_v13 = vadd.f32 %v666_v15, %v1543_v32 }
  0x9a   :  { %2487 = vst [vmem:[#allocation83_spill] sm:$0xff] %v1622_v43  ;;  %v1624_v42 = vld [vmem:[#allocation5 + $0x130] sm:$0xff]  ;;  %v226_v50 = vmul.f32 %v1622_v43, %v1584_v34 }
  0x9b   :  { %2488 = vst [vmem:[#allocation84_spill] sm:$0xff] %v1624_v42  ;;  %v1628_v3 = vld [vmem:[#allocation5 + $0x230] sm:$0xff]  ;;  %v230_v17 = vmul.f32 %v1624_v42, %v1601_v53  ;;  %v291_v15 = vadd.f32 %v290_v47, %v218_v21 }
  0x9c   :  { %v1638_v49 = vld [vmem:[#allocation2 + $0x1d0] sm:$0xff]  ;;  %v584_v59 = vmul.f32 %v1628_v3, %v1607_v12 }
  0x9d   :  { %2491 = vst [vmem:[#allocation27_spill] sm:$0xff] %v1638_v49  ;;  %v1640_v10 = vld [vmem:[#allocation5 + $0x150] sm:$0xff] }
  0x9e   :  { %2492 = vst [vmem:[#allocation30_spill] sm:$0xff] %v1640_v10  ;;  %v1644_v62 = vld [vmem:[#allocation2 + $0x250] sm:$0xff]  ;;  %v234_v38 = vmul.f32 %v1640_v10, %v1603_v19  ;;  %v2505_v19 = vld [vmem:[#allocation19_spill] sm:$0xff] }
  0x9f   :  { %v1646_v6 = vld [vmem:[#allocation5 + $0x250] sm:$0xff]  ;;  %v391_v42 = vadd.f32 %v390_v45, %v2505_v19  ;;  %v1730_v19 = vld [vmem:[#allocation2 + $0x18] sm:$0xff]  ;;  %v1734_v45 = vadd.f32 %v1355_v58, %v1327_v18 }
  0xa0   :  { %2493 = vst [vmem:[#allocation85_spill] sm:$0xff] %v1646_v6  ;;  %v1653_v2 = vld [vmem:[#allocation5 + $0x170] sm:$0xff]  ;;  %v588_v36 = vmul.f32 %v1646_v6, %v1644_v62  ;;  %v292_v6 = vadd.f32 %v291_v15, %v222_v33  ;;  %2509 = vst [vmem:[#allocation93_spill] sm:$0xff] %v1730_v19  ;;  %v1746_v33 = vld [vmem:[#allocation5 + $0x38] sm:$0xff] }
  0xa1   :  { %2496 = vst [vmem:[#allocation86_spill] sm:$0xff] %v1653_v2  ;;  %v1655_v14 = vld [vmem:[#allocation5 + $0x190] sm:$0xff]  ;;  %v1685_v46 = vmul.f32 %v1653_v2, %v1616_v60  ;;  %2512 = vst [vmem:[#allocation96_spill] sm:$0xff] %v1746_v33 }
  0xa2   :  { %2497 = vst [vmem:[#allocation87_spill] sm:$0xff] %v1655_v14  ;;  %v1657_v61 = vld [vmem:[#allocation5 + $0x1b0] sm:$0xff]  ;;  %v1689_v43 = vmul.f32 %v1655_v14, %v1618_v39  ;;  %v672_v39 = vadd.f32 %v584_v59, %v580_v35  ;;  %v395_v35 = vadd.f32 %v1476_v56, %v1457_v37  ;;  %v293_v56 = vadd.f32 %v292_v6, %v226_v50  ;;  %v2518_v6 = vld [vmem:[#allocation20_spill] sm:$0xff] }
  0xa3   :  { %2498 = vst [vmem:[#allocation88_spill] sm:$0xff] %v1657_v61  ;;  %v1667_v63 = vld [vmem:[#allocation5 + $0x1d0] sm:$0xff]  ;;  %v1693_v28 = vmul.f32 %v1657_v61, %v1620_v22  ;;  %v284_v61 = vadd.f32 %v283_v51, %v1408_v55  ;;  %v668_v22 = vadd.f32 %v667_v13, %v1550_v26  ;;  %v2519_v13 = vld [vmem:[#allocation34_spill] sm:$0xff] }
  0xa4   :  { %2499 = vst [vmem:[#allocation89_spill] sm:$0xff] %v1667_v63  ;;  %v1671_v1 = vld [vmem:[#allocation2 + $0x270] sm:$0xff]  ;;  %v1705_v32 = vmul.f32 %v1667_v63, %v1638_v49  ;;  %v673_v47 = vadd.f32 %v672_v39, %v588_v36  ;;  %v1742_v39 = vld [vmem:[#allocation2 + $0x38] sm:$0xff] }
  0xa5   :  { %v1673_v57 = vld [vmem:[#allocation5 + $0x270] sm:$0xff]  ;;  %v669_v55 = vadd.f32 %v668_v22, %v1559_v9  ;;  %2510 = vst [vmem:[#allocation94_spill] sm:$0xff] %v1742_v39  ;;  %v1744_v22 = vld [vmem:[#allocation5 + $0x18] sm:$0xff]  ;;  %v285_v18 = vadd.f32 %v284_v61, %v1416_v48  ;;  %v396_v61 = vadd.f32 %v395_v35, %v1488_v16 }
  0xa6   :  { %v1695_v23 = vld [vmem:[#allocation2 + $0x290] sm:$0xff]  ;;  %v592_v14 = vmul.f32 %v1673_v57, %v1671_v1  ;;  %2511 = vst [vmem:[#allocation95_spill] sm:$0xff] %v1744_v22  ;;  %v1766_v48 = vld [vmem:[#allocation2 + $0x58] sm:$0xff] }
  0xa7   :  { %v1697_v24 = vld [vmem:[#allocation5 + $0x290] sm:$0xff]  ;;  %2521 = vst [vmem:[#allocation34_spill] sm:$0xff] %v1766_v48  ;;  %v1792_v63 = vld [vmem:[#allocation2 + $0x78] sm:$0xff] }
  0xa8   :  { %v1699_v27 = vld [vmem:[#allocation2 + $0x1f0] sm:$0xff]  ;;  %v596_v21 = vmul.f32 %v1697_v24, %v1695_v23  ;;  %v674_v9 = vadd.f32 %v673_v47, %v592_v14  ;;  %v392_v14 = vadd.f32 %v391_v42, %v2518_v6  ;;  %v294_v47 = vadd.f32 %v293_v56, %v230_v17  ;;  %v2528_v6 = vld [vmem:[#allocation44_spill] sm:$0xff]  ;;  %2531 = vst [vmem:[#allocation105_spill] sm:$0xff] %v1792_v63  ;;  %v1794_v49 = vld [vmem:[#allocation5 + $0x78] sm:$0xff] }
  0xa9   :  { %2501 = vst [vmem:[#allocation32_spill] sm:$0xff] %v1699_v27  ;;  %v1701_v10 = vld [vmem:[#allocation5 + $0x1f0] sm:$0xff]  ;;  %v195_v56 = vmul.f32 %v1744_v22, %v1730_v19  ;;  %2532 = vst [vmem:[#allocation106_spill] sm:$0xff] %v1794_v49  ;;  %v1819_v19 = vld [vmem:[#allocation5 + $0x98] sm:$0xff] }
  0xaa   :  { %2502 = vst [vmem:[#allocation90_spill] sm:$0xff] %v1701_v10  ;;  %v1711_v2 = vld [vmem:[#allocation2 + $0x2b0] sm:$0xff]  ;;  %v1724_v26 = vmul.f32 %v1701_v10, %v1699_v27  ;;  %v295_v16 = vadd.f32 %v294_v47, %v234_v38  ;;  %2543 = vst [vmem:[#allocation109_spill] sm:$0xff] %v1819_v19 }
  0xab   :  { %2503 = vst [vmem:[#allocation91_spill] sm:$0xff] %v1711_v2  ;;  %v1713_v60 = vld [vmem:[#allocation5 + $0x2b0] sm:$0xff] }
  0xac   :  { %2504 = vst [vmem:[#allocation92_spill] sm:$0xff] %v1713_v60  ;;  %v2506_v53 = vld [vmem:[#allocation33_spill] sm:$0xff]  ;;  %v600_v37 = vmul.f32 %v1713_v60, %v1711_v2  ;;  %v2544_v60 = vld [vmem:[#allocation24_spill] sm:$0xff] }
  0xad   :  { %v774_v34 = vadd.f32 %v773_v31, %v2506_v53  ;;  %v1726_v59 = vld [vmem:[#allocation2 + $0x2d0] sm:$0xff]  ;;  %v1738_v53 = vadd.f32 %v1367_v8, %v1337_v20  ;;  %v2513_v31 = vld [vmem:[#allocation43_spill] sm:$0xff]  ;;  %v670_v20 = vadd.f32 %v669_v55, %v1563_v25  ;;  %v1768_v25 = vld [vmem:[#allocation5 + $0x58] sm:$0xff]  ;;  %v397_v2 = vadd.f32 %v396_v61, %v2544_v60 }
  0xae   :  { %2507 = vst [vmem:[#allocation19_spill] sm:$0xff] %v1726_v59  ;;  %v1728_v51 = vld [vmem:[#allocation5 + $0x2d0] sm:$0xff]  ;;  %v1750_v36 = vadd.f32 %v2513_v31, %v1339_v11  ;;  %v675_v31 = vadd.f32 %v674_v9, %v596_v21  ;;  %2522 = vst [vmem:[#allocation100_spill] sm:$0xff] %v1768_v25  ;;  %v199_v21 = vmul.f32 %v1746_v33, %v1742_v39  ;;  %v2527_v9 = vld [vmem:[#allocation42_spill] sm:$0xff] }
  0xaf   :  { %2508 = vst [vmem:[#allocation33_spill] sm:$0xff] %v1728_v51  ;;  %v1754_v58 = vld [vmem:[#allocation2 + $0x2f0] sm:$0xff]  ;;  %v775_v15 = vadd.f32 %v774_v34, %v2519_v13  ;;  %v604_v11 = vmul.f32 %v1728_v51, %v1726_v59  ;;  %v671_v55 = vadd.f32 %v670_v20, %v1571_v44  ;;  %v1786_v13 = vadd.f32 %v2528_v6, %v2527_v9  ;;  %v2533_v51 = vld [vmem:[#allocation31_spill] sm:$0xff]  ;;  %v2534_v59 = vld [vmem:[#allocation36_spill] sm:$0xff] }
  0xb0   :  { %2514 = vst [vmem:[#allocation43_spill] sm:$0xff] %v1750_v36  ;;  %2515 = vst [vmem:[#allocation97_spill] sm:$0xff] %v1754_v58  ;;  %v1756_v8 = vld [vmem:[#allocation2 + $0x310] sm:$0xff]  ;;  %v676_v20 = vadd.f32 %v675_v31, %v600_v37  ;;  %v1798_v22 = vadd.f32 %v2534_v59, %v2533_v51  ;;  %v203_v37 = vmul.f32 %v1768_v25, %v1766_v48  ;;  %v2539_v31 = vld [vmem:[#allocation22_spill] sm:$0xff] }
  0xb1   :  { %2516 = vst [vmem:[#allocation98_spill] sm:$0xff] %v1756_v8  ;;  %v1758_v50 = vld [vmem:[#allocation5 + $0x2f0] sm:$0xff]  ;;  %2529 = vst [vmem:[#allocation42_spill] sm:$0xff] %v1786_v13  ;;  %v827_v33 = vadd.f32 %v671_v55, %v285_v18  ;;  %v393_v6 = vadd.f32 %v392_v14, %v2539_v31  ;;  %v296_v13 = vadd.f32 %v295_v16, %v1685_v46  ;;  %v1817_v55 = vld [vmem:[#allocation2 + $0x98] sm:$0xff] }
  0xb2   :  { %2517 = vst [vmem:[#allocation99_spill] sm:$0xff] %v1758_v50  ;;  %v1762_v10 = vld [vmem:[#allocation2 + $0x330] sm:$0xff]  ;;  %v608_v35 = vmul.f32 %v1758_v50, %v1754_v58  ;;  %v2540_v50 = vld [vmem:[#allocation38_spill] sm:$0xff]  ;;  %v677_v18 = vadd.f32 %v676_v20, %v604_v11 }
  0xb3   :  { %2520 = vst [vmem:[#allocation20_spill] sm:$0xff] %v1762_v10  ;;  %v1772_v27 = vld [vmem:[#allocation2 + $0x350] sm:$0xff]  ;;  %v776_v58 = vadd.f32 %v775_v15, %v2540_v50  ;;  %2542 = vst [vmem:[#allocation38_spill] sm:$0xff] %v1817_v55  ;;  %v207_v50 = vmul.f32 %v1794_v49, %v1792_v63  ;;  %v301_v15 = vadd.f32 %v199_v21, %v195_v56  ;;  %v1842_v31 = vld [vmem:[#allocation2 + $0xb8] sm:$0xff] }
  0xb4   :  { %2523 = vst [vmem:[#allocation101_spill] sm:$0xff] %v1772_v27  ;;  %v1774_v42 = vld [vmem:[#allocation2 + $0x370] sm:$0xff]  ;;  %v678_v20 = vadd.f32 %v677_v18, %v608_v35  ;;  %2549 = vst [vmem:[#allocation113_spill] sm:$0xff] %v1842_v31  ;;  %v297_v56 = vadd.f32 %v296_v13, %v1689_v43  ;;  %v1847_v21 = vld [vmem:[#allocation2 + $0xd8] sm:$0xff] }
  0xb5   :  { %2524 = vst [vmem:[#allocation102_spill] sm:$0xff] %v1774_v42  ;;  %v1776_v34 = vld [vmem:[#allocation2 + $0x390] sm:$0xff]  ;;  %843 = vst [vmem:[#allocation7 + $0x8] sm:$0xff] %v827_v33  ;;  %v1860_v33 = vld [vmem:[#allocation2 + $0xf8] sm:$0xff] }
  0xb6   :  { %2525 = vst [vmem:[#allocation103_spill] sm:$0xff] %v1776_v34  ;;  %v1778_v17 = vld [vmem:[#allocation5 + $0x310] sm:$0xff]  ;;  %2551 = vst [vmem:[#allocation115_spill] sm:$0xff] %v1847_v21  ;;  %v1862_v43 = vld [vmem:[#allocation5 + $0xd8] sm:$0xff] }
  0xb7   :  { %2526 = vst [vmem:[#allocation104_spill] sm:$0xff] %v1778_v17  ;;  %v1788_v44 = vld [vmem:[#allocation5 + $0x330] sm:$0xff]  ;;  %v612_v51 = vmul.f32 %v1778_v17, %v1756_v8  ;;  %2554 = vst [vmem:[#allocation116_spill] sm:$0xff] %v1862_v43  ;;  %v1864_v13 = vld [vmem:[#allocation2 + $0x218] sm:$0xff] }
  0xb8   :  { %2530 = vst [vmem:[#allocation44_spill] sm:$0xff] %v1788_v44  ;;  %v1800_v39 = vld [vmem:[#allocation2 + $0x3b0] sm:$0xff]  ;;  %v616_v46 = vmul.f32 %v1788_v44, %v1762_v10  ;;  %v1844_v44 = vld [vmem:[#allocation5 + $0xb8] sm:$0xff]  ;;  %v2552_v10 = vld [vmem:[#allocation39_spill] sm:$0xff] }
  0xb9   :  { %2535 = vst [vmem:[#allocation31_spill] sm:$0xff] %v1800_v39  ;;  %v1802_v9 = vld [vmem:[#allocation5 + $0x350] sm:$0xff]  ;;  %2550 = vst [vmem:[#allocation114_spill] sm:$0xff] %v1844_v44  ;;  %v679_v18 = vadd.f32 %v678_v20, %v612_v51  ;;  %v1877_v51 = vld [vmem:[#allocation5 + $0x238] sm:$0xff] }
  0xba   :  { %2536 = vst [vmem:[#allocation36_spill] sm:$0xff] %v1802_v9  ;;  %v1804_v38 = vld [vmem:[#allocation5 + $0x370] sm:$0xff]  ;;  %v620_v16 = vmul.f32 %v1802_v9, %v1772_v27  ;;  %v211_v9 = vmul.f32 %v1819_v19, %v1817_v55  ;;  %v302_v27 = vadd.f32 %v301_v15, %v203_v37  ;;  %2553 = vst [vmem:[#allocation39_spill] sm:$0xff] %v1860_v33  ;;  %v1873_v15 = vld [vmem:[#allocation2 + $0x238] sm:$0xff] }
  0xbb   :  { %2537 = vst [vmem:[#allocation107_spill] sm:$0xff] %v1804_v38  ;;  %v1806_v47 = vld [vmem:[#allocation5 + $0x390] sm:$0xff]  ;;  %v624_v60 = vmul.f32 %v1804_v38, %v1774_v42  ;;  %v777_v38 = vadd.f32 %v776_v58, %v2552_v10  ;;  %2555 = vst [vmem:[#allocation117_spill] sm:$0xff] %v1864_v13  ;;  %v215_v58 = vmul.f32 %v1844_v44, %v1842_v31  ;;  %v2559_v20 = vld [vmem:[#allocation23_spill] sm:$0xff] }
  0xbc   :  { %2538 = vst [vmem:[#allocation108_spill] sm:$0xff] %v1806_v47  ;;  %v1813_v59 = vld [vmem:[#allocation2 + $0x3d0] sm:$0xff]  ;;  %v1840_v61 = vmul.f32 %v1806_v47, %v1776_v34  ;;  %v398_v34 = vadd.f32 %v397_v2, %v1507_v54  ;;  %v303_v37 = vadd.f32 %v302_v27, %v207_v50  ;;  %2556 = vst [vmem:[#allocation118_spill] sm:$0xff] %v1873_v15  ;;  %v1884_v54 = vld [vmem:[#allocation2 + $0x138] sm:$0xff] }
  0xbd   :  { %2541 = vst [vmem:[#allocation22_spill] sm:$0xff] %v1813_v59  ;;  %v1822_v36 = vld [vmem:[#allocation2 + $0x3f0] sm:$0xff]  ;;  %2558 = vst [vmem:[#allocation120_spill] sm:$0xff] %v1877_v51  ;;  %v1886_v2 = vld [vmem:[#allocation5 + $0xf8] sm:$0xff] }
  0xbe   :  { %2545 = vst [vmem:[#allocation24_spill] sm:$0xff] %v1822_v36  ;;  %v1824_v25 = vld [vmem:[#allocation5 + $0x3b0] sm:$0xff]  ;;  %2561 = vst [vmem:[#allocation121_spill] sm:$0xff] %v1886_v2  ;;  %v2564_v27 = vld [vmem:[#allocation40_spill] sm:$0xff] }
  0xbf   :  { %2546 = vst [vmem:[#allocation110_spill] sm:$0xff] %v1824_v25  ;;  %v1826_v14 = vld [vmem:[#allocation5 + $0x3d0] sm:$0xff]  ;;  %v1854_v47 = vmul.f32 %v1824_v25, %v1800_v39  ;;  %v680_v25 = vadd.f32 %v679_v18, %v616_v46  ;;  %v1882_v39 = vld [vmem:[#allocation2 + $0x118] sm:$0xff]  ;;  %v219_v18 = vmul.f32 %v1862_v43, %v1847_v21  ;;  %v2576_v43 = vld [vmem:[#allocation48_spill] sm:$0xff] }
  0xc0   :  { %2547 = vst [vmem:[#allocation111_spill] sm:$0xff] %v1826_v14  ;;  %v1832_v11 = vld [vmem:[#allocation5 + $0x3f0] sm:$0xff]  ;;  %v1858_v35 = vmul.f32 %v1826_v14, %v1813_v59  ;;  %v1875_v14 = vld [vmem:[#allocation5 + $0x218] sm:$0xff]  ;;  %v1880_v59 = vadd.f32 %v393_v6, %v2559_v20  ;;  %2560 = vst [vmem:[#allocation23_spill] sm:$0xff] %v1882_v39  ;;  %v298_v6 = vadd.f32 %v297_v56, %v1693_v28 }
  0xc1   :  { %2548 = vst [vmem:[#allocation112_spill] sm:$0xff] %v1832_v11  ;;  %v1869_v10 = vmul.f32 %v1832_v11, %v1822_v36  ;;  %2557 = vst [vmem:[#allocation119_spill] sm:$0xff] %v1875_v14  ;;  %v2562_v11 = vld [vmem:[#allocation35_spill] sm:$0xff]  ;;  %v2563_v36 = vld [vmem:[#allocation37_spill] sm:$0xff]  ;;  %v304_v20 = vadd.f32 %v303_v37, %v211_v9  ;;  %v581_v28 = vmul.f32 %v1875_v14, %v1864_v13 }
  0xc2   :  { %v707_v42 = vadd.f32 %v2563_v36, %v2562_v11  ;;  %v2565_v50 = vld [vmem:[#allocation41_spill] sm:$0xff]  ;;  %v2567_v19 = vld [vmem:[#allocation46_spill] sm:$0xff]  ;;  %v399_v9 = vadd.f32 %v398_v34, %v1582_v5  ;;  %v2577_v14 = vld [vmem:[#allocation11_spill] sm:$0xff] }
  0xc3   :  { %v1892_v44 = vadd.f32 %v2565_v50, %v2564_v27  ;;  %v2566_v31 = vld [vmem:[#allocation45_spill] sm:$0xff]  ;;  %v1899_v46 = vld [vmem:[#allocation5 + $0x118] sm:$0xff]  ;;  %v681_v27 = vadd.f32 %v680_v25, %v620_v16  ;;  %v223_v25 = vmul.f32 %v1886_v2, %v1860_v33  ;;  %v305_v16 = vadd.f32 %v304_v20, %v215_v58  ;;  %v2580_v20 = vld [vmem:[#allocation51_spill] sm:$0xff] }
  0xc4   :  { %v1896_v55 = vadd.f32 %v2567_v19, %v2566_v31  ;;  %2568 = vst [vmem:[#allocation35_spill] sm:$0xff] %v1899_v46  ;;  %v1903_v17 = vld [vmem:[#allocation2 + $0x258] sm:$0xff]  ;;  %v585_v31 = vmul.f32 %v1877_v51, %v1873_v15  ;;  %v2578_v13 = vld [vmem:[#allocation49_spill] sm:$0xff]  ;;  %v227_v34 = vmul.f32 %v1899_v46, %v1882_v39 }
  0xc5   :  { %2569 = vst [vmem:[#allocation37_spill] sm:$0xff] %v1903_v17  ;;  %v1905_v8 = vld [vmem:[#allocation5 + $0x258] sm:$0xff]  ;;  %v1933_v63 = vadd.f32 %v2578_v13, %v2577_v14  ;;  %v682_v51 = vadd.f32 %v681_v27, %v624_v60  ;;  %v299_v14 = vadd.f32 %v298_v6, %v1705_v32  ;;  %v306_v13 = vadd.f32 %v305_v16, %v219_v18 }
  0xc6   :  { %2570 = vst [vmem:[#allocation40_spill] sm:$0xff] %v1905_v8  ;;  %v2571_v36 = vld [vmem:[#allocation50_spill] sm:$0xff]  ;;  %v589_v58 = vmul.f32 %v1905_v8, %v1903_v17  ;;  %v687_v33 = vadd.f32 %v585_v31, %v581_v28  ;;  %v2582_v8 = vld [vmem:[#allocation52_spill] sm:$0xff] }
  0xc7   :  { %v778_v11 = vadd.f32 %v777_v38, %v2571_v36  ;;  %v1908_v50 = vld [vmem:[#allocation5 + $0x138] sm:$0xff]  ;;  %v2575_v36 = vld [vmem:[#allocation47_spill] sm:$0xff]  ;;  %v683_v46 = vadd.f32 %v682_v51, %v1840_v61  ;;  %v307_v18 = vadd.f32 %v306_v13, %v223_v25 }
  0xc8   :  { %v1910_v49 = vld [vmem:[#allocation2 + $0x278] sm:$0xff]  ;;  %v1929_v21 = vadd.f32 %v2576_v43, %v2575_v36  ;;  %v2581_v43 = vld [vmem:[#allocation55_spill] sm:$0xff]  ;;  %v231_v60 = vmul.f32 %v1908_v50, %v1884_v54 }
  0xc9   :  { %v1912_v19 = vld [vmem:[#allocation5 + $0x278] sm:$0xff]  ;;  %v1947_v36 = vadd.f32 %v2581_v43, %v2580_v20  ;;  %v779_v17 = vadd.f32 %v778_v11, %v2582_v8  ;;  %v400_v20 = vadd.f32 %v399_v9, %v1594_v4  ;;  %v684_v51 = vadd.f32 %v683_v46, %v1854_v47 }
  0xca   :  { %v1919_v56 = vld [vmem:[#allocation2 + $0x158] sm:$0xff]  ;;  %v593_v27 = vmul.f32 %v1912_v19, %v1910_v49  ;;  %v688_v4 = vadd.f32 %v687_v33, %v589_v58  ;;  %v308_v13 = vadd.f32 %v307_v18, %v227_v34  ;;  %v781_v46 = vadd.f32 %v707_v42, %v1798_v22 }
  0xcb   :  { %2572 = vst [vmem:[#allocation41_spill] sm:$0xff] %v1919_v56  ;;  %v1921_v37 = vld [vmem:[#allocation2 + $0x178] sm:$0xff]  ;;  %v401_v9 = vadd.f32 %v400_v20, %v1598_v41 }
  0xcc   :  { %2573 = vst [vmem:[#allocation45_spill] sm:$0xff] %v1921_v37  ;;  %v1923_v38 = vld [vmem:[#allocation5 + $0x158] sm:$0xff]  ;;  %v689_v41 = vadd.f32 %v688_v4, %v593_v27  ;;  %v309_v20 = vadd.f32 %v308_v13, %v231_v60  ;;  %v782_v18 = vadd.f32 %v781_v46, %v1892_v44 }
  0xcd   :  { %2574 = vst [vmem:[#allocation46_spill] sm:$0xff] %v1923_v38  ;;  %v1935_v5 = vld [vmem:[#allocation5 + $0x178] sm:$0xff]  ;;  %v235_v32 = vmul.f32 %v1923_v38, %v1919_v56  ;;  %v300_v38 = vadd.f32 %v299_v14, %v1724_v26  ;;  %v402_v58 = vadd.f32 %v401_v9, %v1614_v52 }
  0xce   :  { %2579 = vst [vmem:[#allocation50_spill] sm:$0xff] %v1935_v5  ;;  %v1939_v15 = vld [vmem:[#allocation2 + $0x298] sm:$0xff]  ;;  %v239_v6 = vmul.f32 %v1935_v5, %v1921_v37  ;;  %v685_v37 = vadd.f32 %v684_v51, %v1858_v35  ;;  %v783_v9 = vadd.f32 %v782_v18, %v1896_v55 }
  0xcf   :  { %v1941_v48 = vld [vmem:[#allocation5 + $0x298] sm:$0xff]  ;;  %v403_v4 = vadd.f32 %v402_v58, %v1632_v7  ;;  %v2595_v58 = vld [vmem:[#allocation57_spill] sm:$0xff] }
  0xd0   :  { %v1955_v39 = vld [vmem:[#allocation2 + $0x2b8] sm:$0xff]  ;;  %v597_v61 = vmul.f32 %v1941_v48, %v1939_v15  ;;  %v686_v27 = vadd.f32 %v685_v37, %v1869_v10 }
  0xd1   :  { %v1957_v2 = vld [vmem:[#allocation5 + $0x2b8] sm:$0xff]  ;;  %v404_v55 = vadd.f32 %v403_v4, %v1636_v30  ;;  %v2604_v30 = vld [vmem:[#allocation16_spill] sm:$0xff] }
  0xd2   :  { %v1961_v43 = vld [vmem:[#allocation2 + $0x198] sm:$0xff]  ;;  %v601_v47 = vmul.f32 %v1957_v2, %v1955_v39  ;;  %v690_v51 = vadd.f32 %v689_v41, %v597_v61  ;;  %v828_v44 = vadd.f32 %v686_v27, %v300_v38  ;;  %v784_v38 = vadd.f32 %v783_v9, %v1929_v21  ;;  %v2597_v27 = vld [vmem:[#allocation60_spill] sm:$0xff]  ;;  %v2605_v21 = vld [vmem:[#allocation15_spill] sm:$0xff] }
  0xd3   :  { %2583 = vst [vmem:[#allocation47_spill] sm:$0xff] %v1961_v43  ;;  %v1970_v16 = vld [vmem:[#allocation5 + $0x198] sm:$0xff] }
  0xd4   :  { %2584 = vst [vmem:[#allocation48_spill] sm:$0xff] %v1970_v16  ;;  %v1972_v28 = vld [vmem:[#allocation2 + $0x2d8] sm:$0xff]  ;;  %v243_v34 = vmul.f32 %v1970_v16, %v1961_v43  ;;  %v691_v61 = vadd.f32 %v690_v51, %v601_v47  ;;  %v322_v47 = vadd.f32 %v2597_v27, %v1467_v29  ;;  %844 = vst [vmem:[#allocation7 + $0x10] sm:$0xff] %v828_v44 }
  0xd5   :  { %v1974_v8 = vld [vmem:[#allocation5 + $0x2d8] sm:$0xff] }
  0xd6   :  { %v2585_v11 = vld [vmem:[#allocation26_spill] sm:$0xff]  ;;  %v605_v35 = vmul.f32 %v1974_v8, %v1972_v28 }
  0xd7   :  { %v780_v31 = vadd.f32 %v779_v17, %v2585_v11  ;;  %v1979_v5 = vld [vmem:[#allocation2 + $0x1b8] sm:$0xff] }
  0xd8   :  { %2586 = vst [vmem:[#allocation11_spill] sm:$0xff] %v1979_v5  ;;  %v1981_v25 = vld [vmem:[#allocation2 + $0x1d8] sm:$0xff]  ;;  %v692_v41 = vadd.f32 %v691_v61, %v605_v35  ;;  %v2606_v35 = vld [vmem:[#allocation21_spill] sm:$0xff]  ;;  %v785_v61 = vadd.f32 %v784_v38, %v1933_v63 }
  0xd9   :  { %2587 = vst [vmem:[#allocation49_spill] sm:$0xff] %v1981_v25  ;;  %v1987_v56 = vld [vmem:[#allocation2 + $0x1f8] sm:$0xff]  ;;  %v830_v26 = vadd.f32 %v780_v31, %v1880_v59  ;;  %v310_v31 = vadd.f32 %v309_v20, %v235_v32  ;;  %v2596_v20 = vld [vmem:[#allocation59_spill] sm:$0xff]  ;;  %v739_v9 = vadd.f32 %v2606_v35, %v2605_v21 }
  0xda   :  { %2588 = vst [vmem:[#allocation51_spill] sm:$0xff] %v1987_v56  ;;  %v1989_v33 = vld [vmem:[#allocation5 + $0x1b8] sm:$0xff]  ;;  %v318_v18 = vadd.f32 %v2596_v20, %v2595_v58  ;;  %v786_v43 = vadd.f32 %v785_v61, %v1947_v36 }
  0xdb   :  { %2589 = vst [vmem:[#allocation55_spill] sm:$0xff] %v1989_v33  ;;  %v1991_v17 = vld [vmem:[#allocation5 + $0x1d8] sm:$0xff]  ;;  %v247_v60 = vmul.f32 %v1989_v33, %v1979_v5  ;;  %855 = vst [vmem:[#allocation7 + $0x20] sm:$0xff] %v830_v26  ;;  %v311_v7 = vadd.f32 %v310_v31, %v239_v6  ;;  %v2601_v31 = vld [vmem:[#allocation53_spill] sm:$0xff] }
  0xdc   :  { %2590 = vst [vmem:[#allocation52_spill] sm:$0xff] %v1991_v17  ;;  %v1995_v14 = vld [vmem:[#allocation5 + $0x1f8] sm:$0xff]  ;;  %v2016_v11 = vmul.f32 %v1991_v17, %v1981_v25 }
  0xdd   :  { %2591 = vst [vmem:[#allocation26_spill] sm:$0xff] %v1995_v14  ;;  %v1999_v22 = vld [vmem:[#allocation2 + $0x2f8] sm:$0xff]  ;;  %v2021_v10 = vmul.f32 %v1995_v14, %v1987_v56  ;;  %v2602_v14 = vld [vmem:[#allocation56_spill] sm:$0xff]  ;;  %v312_v21 = vadd.f32 %v311_v7, %v243_v34 }
  0xde   :  { %v2001_v42 = vld [vmem:[#allocation5 + $0x2f8] sm:$0xff]  ;;  %v731_v56 = vadd.f32 %v2602_v14, %v2601_v31  ;;  %v2610_v14 = vld [vmem:[#allocation17_spill] sm:$0xff] }
  0xdf   :  { %v2007_v59 = vld [vmem:[#allocation2 + $0x318] sm:$0xff]  ;;  %v609_v37 = vmul.f32 %v2001_v42, %v1999_v22  ;;  %v2611_v31 = vld [vmem:[#allocation61_spill] sm:$0xff] }
  0xe0   :  { %2592 = vst [vmem:[#allocation122_spill] sm:$0xff] %v2007_v59  ;;  %v2009_v52 = vld [vmem:[#allocation5 + $0x318] sm:$0xff]  ;;  %v743_v33 = vadd.f32 %v2611_v31, %v2610_v14  ;;  %v2618_v14 = vld [vmem:[#allocation69_spill] sm:$0xff]  ;;  %v787_v36 = vadd.f32 %v786_v43, %v731_v56 }
  0xe1   :  { %2593 = vst [vmem:[#allocation123_spill] sm:$0xff] %v2009_v52  ;;  %v2025_v13 = vld [vmem:[#allocation2 + $0x338] sm:$0xff]  ;;  %v613_v32 = vmul.f32 %v2009_v52, %v2007_v59  ;;  %v693_v25 = vadd.f32 %v692_v41, %v609_v37  ;;  %v2625_v56 = vld [vmem:[#allocation77_spill] sm:$0xff] }
  0xe2   :  { %v2027_v46 = vld [vmem:[#allocation5 + $0x338] sm:$0xff] }
  0xe3   :  { %2594 = vst [vmem:[#allocation124_spill] sm:$0xff] %v2027_v46  ;;  %v2037_v26 = vld [vmem:[#allocation2 + $0x358] sm:$0xff]  ;;  %v617_v27 = vmul.f32 %v2027_v46, %v2025_v13  ;;  %v694_v41 = vadd.f32 %v693_v25, %v613_v32 }
  0xe4   :  { %2598 = vst [vmem:[#allocation57_spill] sm:$0xff] %v2037_v26  ;;  %v2039_v6 = vld [vmem:[#allocation2 + $0x378] sm:$0xff] }
  0xe5   :  { %2599 = vst [vmem:[#allocation59_spill] sm:$0xff] %v2039_v6  ;;  %v2041_v51 = vld [vmem:[#allocation5 + $0x358] sm:$0xff] }
  0xe6   :  { %2600 = vst [vmem:[#allocation60_spill] sm:$0xff] %v2041_v51  ;;  %v2603_v17 = vld [vmem:[#allocation54_spill] sm:$0xff]  ;;  %v621_v37 = vmul.f32 %v2041_v51, %v2037_v26  ;;  %v704_v26 = vadd.f32 %v1609_v40, %v1605_v0  ;;  %v2630_v0 = vld [vmem:[#allocation85_spill] sm:$0xff] }
  0xe7   :  { %v735_v4 = vadd.f32 %v2604_v30, %v2603_v17  ;;  %v2050_v58 = vld [vmem:[#allocation2 + $0x398] sm:$0xff]  ;;  %v2612_v17 = vld [vmem:[#allocation63_spill] sm:$0xff]  ;;  %v2613_v30 = vld [vmem:[#allocation64_spill] sm:$0xff]  ;;  %v712_v40 = vadd.f32 %v2630_v0, %v1644_v62 }
  0xe8   :  { %2607 = vst [vmem:[#allocation53_spill] sm:$0xff] %v2050_v58  ;;  %v2052_v29 = vld [vmem:[#allocation5 + $0x378] sm:$0xff]  ;;  %v326_v5 = vadd.f32 %v2613_v30, %v2612_v17  ;;  %v410_v17 = vadd.f32 %v322_v47, %v318_v18  ;;  %v2620_v30 = vld [vmem:[#allocation12_spill] sm:$0xff]  ;;  %v695_v18 = vadd.f32 %v694_v41, %v617_v27  ;;  %v2628_v41 = vld [vmem:[#allocation75_spill] sm:$0xff] }
  0xe9   :  { %2608 = vst [vmem:[#allocation56_spill] sm:$0xff] %v2052_v29  ;;  %v2054_v20 = vld [vmem:[#allocation5 + $0x398] sm:$0xff]  ;;  %v625_v7 = vmul.f32 %v2052_v29, %v2039_v6  ;;  %v2622_v47 = vld [vmem:[#allocation72_spill] sm:$0xff]  ;;  %v313_v6 = vadd.f32 %v312_v21, %v247_v60  ;;  %v2626_v60 = vld [vmem:[#allocation25_spill] sm:$0xff] }
  0xea   :  { %2609 = vst [vmem:[#allocation54_spill] sm:$0xff] %v2054_v20  ;;  %v2062_v35 = vld [vmem:[#allocation2 + $0x3b8] sm:$0xff]  ;;  %v411_v29 = vadd.f32 %v410_v17, %v326_v5 }
  0xeb   :  { %v2064_v63 = vld [vmem:[#allocation5 + $0x3b8] sm:$0xff] }
  0xec   :  { %2614 = vst [vmem:[#allocation16_spill] sm:$0xff] %v2064_v63  ;;  %v2615_v44 = vld [vmem:[#allocation18_spill] sm:$0xff]  ;;  %v633_v32 = vmul.f32 %v2064_v63, %v2062_v35  ;;  %v708_v63 = vadd.f32 %v1628_v3, %v1607_v12  ;;  %v314_v3 = vadd.f32 %v313_v6, %v2016_v11  ;;  %v2638_v6 = vld [vmem:[#allocation83_spill] sm:$0xff] }
  0xed   :  { %v405_v38 = vadd.f32 %v404_v55, %v2615_v44  ;;  %v2616_v52 = vld [vmem:[#allocation58_spill] sm:$0xff]  ;;  %v629_v55 = vmul.f32 %v2054_v20, %v2050_v58  ;;  %v788_v58 = vadd.f32 %v787_v36, %v735_v4  ;;  %v2631_v36 = vld [vmem:[#allocation76_spill] sm:$0xff] }
  0xee   :  { %v2617_v59 = vld [vmem:[#allocation62_spill] sm:$0xff] }
  0xef   :  { %v747_v16 = vadd.f32 %v2617_v59, %v2616_v52  ;;  %v2619_v31 = vld [vmem:[#allocation70_spill] sm:$0xff]  ;;  %v406_v20 = vadd.f32 %v405_v38, %v1734_v45  ;;  %v2627_v45 = vld [vmem:[#allocation67_spill] sm:$0xff]  ;;  %v789_v21 = vadd.f32 %v788_v58, %v739_v9  ;;  %v716_v9 = vadd.f32 %v1673_v57, %v1671_v1 }
  0xf0   :  { %v330_v46 = vadd.f32 %v2619_v31, %v2618_v14  ;;  %v2074_v34 = vld [vmem:[#allocation2 + $0x3d8] sm:$0xff]  ;;  %v2623_v14 = vld [vmem:[#allocation73_spill] sm:$0xff]  ;;  %v755_v4 = vadd.f32 %v2627_v45, %v2626_v60  ;;  %v796_v58 = vadd.f32 %v708_v63, %v704_v26  ;;  %v315_v45 = vadd.f32 %v314_v3, %v2021_v10  ;;  %v2639_v57 = vld [vmem:[#allocation43_spill] sm:$0xff] }
  0xf1   :  { %v2621_v59 = vld [vmem:[#allocation66_spill] sm:$0xff]  ;;  %v334_v31 = vadd.f32 %v2623_v14, %v2622_v47  ;;  %v407_v12 = vadd.f32 %v406_v20, %v1738_v53  ;;  %v790_v17 = vadd.f32 %v789_v21, %v743_v33  ;;  %v2640_v63 = vld [vmem:[#allocation28_spill] sm:$0xff] }
  0xf2   :  { %v751_v52 = vadd.f32 %v2621_v59, %v2620_v30  ;;  %v2082_v61 = vld [vmem:[#allocation2 + $0x3f8] sm:$0xff]  ;;  %v696_v59 = vadd.f32 %v695_v18, %v621_v37  ;;  %v412_v51 = vadd.f32 %v411_v29, %v330_v46  ;;  %v2632_v18 = vld [vmem:[#allocation79_spill] sm:$0xff]  ;;  %v2641_v21 = vld [vmem:[#allocation84_spill] sm:$0xff] }
  0xf3   :  { %v2084_v44 = vld [vmem:[#allocation5 + $0x3d8] sm:$0xff]  ;;  %v346_v47 = vadd.f32 %v2632_v18, %v2631_v36  ;;  %v791_v60 = vadd.f32 %v790_v17, %v747_v16  ;;  %v408_v1 = vadd.f32 %v407_v12, %v2639_v57  ;;  %v2642_v16 = vld [vmem:[#allocation91_spill] sm:$0xff]  ;;  %v2649_v3 = vld [vmem:[#allocation96_spill] sm:$0xff] }
  0xf4   :  { %v2086_v25 = vld [vmem:[#allocation5 + $0x3f8] sm:$0xff]  ;;  %v637_v27 = vmul.f32 %v2084_v44, %v2074_v34  ;;  %v697_v38 = vadd.f32 %v696_v59, %v625_v7  ;;  %v413_v29 = vadd.f32 %v412_v51, %v334_v31  ;;  %v2633_v7 = vld [vmem:[#allocation65_spill] sm:$0xff]  ;;  %v2636_v59 = vld [vmem:[#allocation71_spill] sm:$0xff] }
  0xf5   :  { %v2624_v30 = vld [vmem:[#allocation74_spill] sm:$0xff]  ;;  %v641_v5 = vmul.f32 %v2086_v25, %v2082_v61  ;;  %v2635_v31 = vld [vmem:[#allocation13_spill] sm:$0xff]  ;;  %v792_v26 = vadd.f32 %v791_v60, %v751_v52  ;;  %v2658_v57 = vld [vmem:[#allocation99_spill] sm:$0xff] }
  0xf6   :  { %v338_v43 = vadd.f32 %v2625_v56, %v2624_v30  ;;  %v2629_v37 = vld [vmem:[#allocation78_spill] sm:$0xff]  ;;  %v698_v14 = vadd.f32 %v697_v38, %v629_v55  ;;  %v2634_v56 = vld [vmem:[#allocation68_spill] sm:$0xff]  ;;  %v763_v62 = vadd.f32 %v2636_v59, %v2635_v31  ;;  %v720_v55 = vadd.f32 %v1697_v24, %v1695_v23  ;;  %v2646_v23 = vld [vmem:[#allocation93_spill] sm:$0xff] }
  0xf7   :  { %v342_v46 = vadd.f32 %v2629_v37, %v2628_v41  ;;  %v759_v51 = vadd.f32 %v2634_v56, %v2633_v7  ;;  %v2637_v11 = vld [vmem:[#allocation14_spill] sm:$0xff]  ;;  %v354_v38 = vadd.f32 %v2641_v21, %v2640_v63  ;;  %v2647_v24 = vld [vmem:[#allocation95_spill] sm:$0xff]  ;;  %v2659_v63 = vld [vmem:[#allocation81_spill] sm:$0xff] }
  0xf8   :  { %v414_v30 = vadd.f32 %v413_v29, %v338_v43  ;;  %v350_v53 = vadd.f32 %v2638_v6, %v2637_v11  ;;  %v699_v33 = vadd.f32 %v698_v14, %v633_v32  ;;  %v797_v43 = vadd.f32 %v796_v58, %v712_v40  ;;  %v2643_v29 = vld [vmem:[#allocation92_spill] sm:$0xff]  ;;  %v2645_v36 = vld [vmem:[#allocation30_spill] sm:$0xff]  ;;  %v2651_v58 = vld [vmem:[#allocation33_spill] sm:$0xff] }
  0xf9   :  { %v724_v0 = vadd.f32 %v2643_v29, %v2642_v16  ;;  %v793_v32 = vadd.f32 %v792_v26, %v755_v4  ;;  %v319_v40 = vadd.f32 %v2647_v24, %v2646_v23  ;;  %v2648_v10 = vld [vmem:[#allocation94_spill] sm:$0xff]  ;;  %v2656_v11 = vld [vmem:[#allocation100_spill] sm:$0xff]  ;;  %v2660_v21 = vld [vmem:[#allocation87_spill] sm:$0xff] }
  0xfa   :  { %v415_v20 = vadd.f32 %v414_v30, %v342_v46  ;;  %v700_v41 = vadd.f32 %v699_v33, %v637_v27  ;;  %v798_v17 = vadd.f32 %v797_v43, %v716_v9  ;;  %v2644_v46 = vld [vmem:[#allocation80_spill] sm:$0xff]  ;;  %v323_v12 = vadd.f32 %v2649_v3, %v2648_v10  ;;  %v2650_v30 = vld [vmem:[#allocation19_spill] sm:$0xff]  ;;  %v2652_v7 = vld [vmem:[#allocation42_spill] sm:$0xff] }
  0xfb   :  { %v358_v18 = vadd.f32 %v2645_v36, %v2644_v46  ;;  %v728_v27 = vadd.f32 %v2651_v58, %v2650_v30  ;;  %v409_v56 = vadd.f32 %v408_v1, %v2652_v7  ;;  %v794_v31 = vadd.f32 %v793_v32, %v759_v51  ;;  %v2653_v9 = vld [vmem:[#allocation29_spill] sm:$0xff]  ;;  %v2654_v4 = vld [vmem:[#allocation86_spill] sm:$0xff]  ;;  %v2668_v10 = vld [vmem:[#allocation44_spill] sm:$0xff] }
  0xfc   :  { %v416_v37 = vadd.f32 %v415_v20, %v346_v47  ;;  %v701_v52 = vadd.f32 %v700_v41, %v641_v5  ;;  %v799_v47 = vadd.f32 %v798_v17, %v720_v55  ;;  %v362_v59 = vadd.f32 %v2654_v4, %v2653_v9  ;;  %v2655_v60 = vld [vmem:[#allocation34_spill] sm:$0xff]  ;;  %v2657_v43 = vld [vmem:[#allocation97_spill] sm:$0xff]  ;;  %v2664_v17 = vld [vmem:[#allocation104_spill] sm:$0xff] }
  0xfd   :  { %v327_v6 = vadd.f32 %v2656_v11, %v2655_v60  ;;  %v732_v26 = vadd.f32 %v2658_v57, %v2657_v43  ;;  %v366_v41 = vadd.f32 %v2660_v21, %v2659_v63  ;;  %v2661_v55 = vld [vmem:[#allocation105_spill] sm:$0xff]  ;;  %v425_v51 = vadd.f32 %v323_v12, %v319_v40  ;;  %v2663_v29 = vld [vmem:[#allocation98_spill] sm:$0xff]  ;;  %v2672_v12 = vld [vmem:[#allocation119_spill] sm:$0xff] }
  0xfe   :  { %v417_v14 = vadd.f32 %v416_v37, %v350_v53  ;;  %v829_v33 = vadd.f32 %v701_v52, %v315_v45  ;;  %v800_v5 = vadd.f32 %v799_v47, %v724_v0  ;;  %v795_v53 = vadd.f32 %v794_v31, %v763_v62  ;;  %v2662_v37 = vld [vmem:[#allocation106_spill] sm:$0xff]  ;;  %v2667_v62 = vld [vmem:[#allocation20_spill] sm:$0xff]  ;;  %v2677_v11 = vld [vmem:[#allocation101_spill] sm:$0xff] }
  0xff   :  { %v331_v1 = vadd.f32 %v2662_v37, %v2661_v55  ;;  %v736_v32 = vadd.f32 %v2664_v17, %v2663_v29  ;;  %v2665_v45 = vld [vmem:[#allocation38_spill] sm:$0xff]  ;;  %v426_v24 = vadd.f32 %v425_v51, %v327_v6  ;;  %v740_v3 = vadd.f32 %v2668_v10, %v2667_v62  ;;  %v2676_v9 = vld [vmem:[#allocation88_spill] sm:$0xff]  ;;  %v2684_v55 = vld [vmem:[#allocation107_spill] sm:$0xff] }
 0x100   :  { %v418_v20 = vadd.f32 %v417_v14, %v354_v38  ;;  %v801_v46 = vadd.f32 %v800_v5, %v728_v27  ;;  %v831_v36 = vadd.f32 %v795_v53, %v409_v56  ;;  %v2666_v38 = vld [vmem:[#allocation109_spill] sm:$0xff]  ;;  %845 = vst [vmem:[#allocation7 + $0x18] sm:$0xff] %v829_v33  ;;  %v2670_v30 = vld [vmem:[#allocation114_spill] sm:$0xff]  ;;  %v2674_v27 = vld [vmem:[#allocation120_spill] sm:$0xff]  ;;  %v717_v17 = vadd.f32 %v1912_v19, %v1910_v49 }
 0x101   :  { %v335_v23 = vadd.f32 %v2666_v38, %v2665_v45  ;;  %v2669_v14 = vld [vmem:[#allocation113_spill] sm:$0xff]  ;;  %v427_v40 = vadd.f32 %v426_v24, %v331_v1  ;;  %v2673_v7 = vld [vmem:[#allocation118_spill] sm:$0xff]  ;;  %v2680_v43 = vld [vmem:[#allocation116_spill] sm:$0xff] }
 0x102   :  { %v419_v16 = vadd.f32 %v418_v20, %v358_v18  ;;  %v802_v52 = vadd.f32 %v801_v46, %v732_v26  ;;  %v339_v58 = vadd.f32 %v2670_v30, %v2669_v14  ;;  %v2671_v18 = vld [vmem:[#allocation117_spill] sm:$0xff]  ;;  %v709_v56 = vadd.f32 %v2674_v27, %v2673_v7  ;;  %v2675_v31 = vld [vmem:[#allocation82_spill] sm:$0xff]  ;;  %856 = vst [vmem:[#allocation7 + $0x28] sm:$0xff] %v831_v36  ;;  %v2679_v20 = vld [vmem:[#allocation115_spill] sm:$0xff] }
 0x103   :  { %v705_v47 = vadd.f32 %v2672_v12, %v2671_v18  ;;  %v370_v4 = vadd.f32 %v2676_v9, %v2675_v31  ;;  %v343_v57 = vadd.f32 %v2680_v43, %v2679_v20  ;;  %v428_v26 = vadd.f32 %v427_v40, %v335_v23  ;;  %v2681_v5 = vld [vmem:[#allocation37_spill] sm:$0xff]  ;;  %v2682_v53 = vld [vmem:[#allocation40_spill] sm:$0xff]  ;;  %v2683_v21 = vld [vmem:[#allocation102_spill] sm:$0xff] }
 0x104   :  { %v420_v0 = vadd.f32 %v419_v16, %v362_v59  ;;  %v2678_v59 = vld [vmem:[#allocation36_spill] sm:$0xff]  ;;  %v803_v33 = vadd.f32 %v802_v52, %v736_v32  ;;  %v713_v63 = vadd.f32 %v2682_v53, %v2681_v5  ;;  %v748_v37 = vadd.f32 %v2684_v55, %v2683_v21  ;;  %v2685_v51 = vld [vmem:[#allocation39_spill] sm:$0xff]  ;;  %v2686_v16 = vld [vmem:[#allocation121_spill] sm:$0xff] }
 0x105   :  { %v744_v6 = vadd.f32 %v2678_v59, %v2677_v11  ;;  %v347_v29 = vadd.f32 %v2686_v16, %v2685_v51  ;;  %v811_v32 = vadd.f32 %v709_v56, %v705_v47  ;;  %v2687_v46 = vld [vmem:[#allocation27_spill] sm:$0xff]  ;;  %v2688_v36 = vld [vmem:[#allocation89_spill] sm:$0xff]  ;;  %v2690_v24 = vld [vmem:[#allocation108_spill] sm:$0xff]  ;;  %v721_v30 = vadd.f32 %v1941_v48, %v1939_v15 }
 0x106   :  { %v421_v60 = vadd.f32 %v420_v0, %v366_v41  ;;  %v804_v1 = vadd.f32 %v803_v33, %v740_v3  ;;  %v429_v41 = vadd.f32 %v428_v26, %v339_v58  ;;  %v374_v45 = vadd.f32 %v2688_v36, %v2687_v46  ;;  %v2689_v23 = vld [vmem:[#allocation103_spill] sm:$0xff]  ;;  %v2694_v18 = vld [vmem:[#allocation110_spill] sm:$0xff]  ;;  %v2695_v56 = vld [vmem:[#allocation32_spill] sm:$0xff] }
 0x107   :  { %v752_v0 = vadd.f32 %v2690_v24, %v2689_v23  ;;  %v2691_v10 = vld [vmem:[#allocation23_spill] sm:$0xff]  ;;  %v812_v58 = vadd.f32 %v811_v32, %v713_v63  ;;  %v355_v12 = vadd.f32 %v1908_v50, %v1884_v54  ;;  %v725_v7 = vadd.f32 %v1957_v2, %v1955_v39  ;;  %v2696_v31 = vld [vmem:[#allocation90_spill] sm:$0xff]  ;;  %v2699_v59 = vld [vmem:[#allocation41_spill] sm:$0xff] }
 0x108   :  { %v422_v38 = vadd.f32 %v421_v60, %v370_v4  ;;  %v805_v62 = vadd.f32 %v804_v1, %v744_v6  ;;  %v2692_v52 = vld [vmem:[#allocation35_spill] sm:$0xff]  ;;  %v430_v3 = vadd.f32 %v429_v41, %v343_v57  ;;  %v378_v9 = vadd.f32 %v2696_v31, %v2695_v56  ;;  %v2697_v60 = vld [vmem:[#allocation22_spill] sm:$0xff]  ;;  %v2701_v43 = vld [vmem:[#allocation24_spill] sm:$0xff] }
 0x109   :  { %v351_v14 = vadd.f32 %v2692_v52, %v2691_v10  ;;  %v2693_v40 = vld [vmem:[#allocation31_spill] sm:$0xff]  ;;  %v813_v27 = vadd.f32 %v812_v58, %v717_v17  ;;  %v2700_v6 = vld [vmem:[#allocation46_spill] sm:$0xff]  ;;  %v729_v54 = vadd.f32 %v1974_v8, %v1972_v28  ;;  %v2702_v57 = vld [vmem:[#allocation112_spill] sm:$0xff]  ;;  %v733_v21 = vadd.f32 %v2001_v42, %v1999_v22 }
 0x10a   :  { %v756_v49 = vadd.f32 %v2694_v18, %v2693_v40  ;;  %v806_v19 = vadd.f32 %v805_v62, %v748_v37  ;;  %v431_v47 = vadd.f32 %v430_v3, %v347_v29  ;;  %v423_v4 = vadd.f32 %v422_v38, %v374_v45  ;;  %v2698_v11 = vld [vmem:[#allocation111_spill] sm:$0xff]  ;;  %v2703_v26 = vld [vmem:[#allocation45_spill] sm:$0xff]  ;;  %v2704_v5 = vld [vmem:[#allocation50_spill] sm:$0xff] }
 0x10b   :  { %v760_v48 = vadd.f32 %v2698_v11, %v2697_v60  ;;  %v359_v33 = vadd.f32 %v2700_v6, %v2699_v59  ;;  %v814_v50 = vadd.f32 %v813_v27, %v721_v30  ;;  %v764_v39 = vadd.f32 %v2702_v57, %v2701_v43  ;;  %v2705_v51 = vld [vmem:[#allocation47_spill] sm:$0xff]  ;;  %v2706_v16 = vld [vmem:[#allocation48_spill] sm:$0xff]  ;;  %v2707_v28 = vld [vmem:[#allocation122_spill] sm:$0xff] }
 0x10c   :  { %v807_v15 = vadd.f32 %v806_v19, %v752_v0  ;;  %v432_v20 = vadd.f32 %v431_v47, %v351_v14  ;;  %v363_v53 = vadd.f32 %v2704_v5, %v2703_v26  ;;  %v424_v37 = vadd.f32 %v423_v4, %v378_v9  ;;  %v2708_v8 = vld [vmem:[#allocation123_spill] sm:$0xff]  ;;  %v2709_v45 = vld [vmem:[#allocation124_spill] sm:$0xff]  ;;  %v2712_v10 = vld [vmem:[#allocation57_spill] sm:$0xff] }
 0x10d   :  { %v815_v55 = vadd.f32 %v814_v50, %v725_v7  ;;  %v367_v29 = vadd.f32 %v2706_v16, %v2705_v51  ;;  %v737_v17 = vadd.f32 %v2708_v8, %v2707_v28  ;;  %v741_v38 = vadd.f32 %v2709_v45, %v2025_v13  ;;  %v2710_v0 = vld [vmem:[#allocation11_spill] sm:$0xff]  ;;  %v2713_v52 = vld [vmem:[#allocation60_spill] sm:$0xff]  ;;  %v2718_v13 = vld [vmem:[#allocation53_spill] sm:$0xff] }
 0x10e   :  { %v808_v2 = vadd.f32 %v807_v15, %v756_v49  ;;  %v433_v63 = vadd.f32 %v432_v20, %v355_v12  ;;  %v2711_v22 = vld [vmem:[#allocation55_spill] sm:$0xff]  ;;  %v745_v14 = vadd.f32 %v2713_v52, %v2712_v10  ;;  %v2715_v58 = vld [vmem:[#allocation56_spill] sm:$0xff]  ;;  %v2716_v49 = vld [vmem:[#allocation49_spill] sm:$0xff]  ;;  %v761_v59 = vadd.f32 %v2084_v44, %v2074_v34 }
 0x10f   :  { %v816_v32 = vadd.f32 %v815_v55, %v729_v54  ;;  %v371_v42 = vadd.f32 %v2711_v22, %v2710_v0  ;;  %v2714_v30 = vld [vmem:[#allocation59_spill] sm:$0xff]  ;;  %v2717_v19 = vld [vmem:[#allocation52_spill] sm:$0xff]  ;;  %v2719_v7 = vld [vmem:[#allocation54_spill] sm:$0xff] }
 0x110   :  { %v809_v1 = vadd.f32 %v808_v2, %v760_v48  ;;  %v434_v41 = vadd.f32 %v433_v63, %v359_v33  ;;  %v749_v40 = vadd.f32 %v2715_v58, %v2714_v30  ;;  %v375_v12 = vadd.f32 %v2717_v19, %v2716_v49  ;;  %v2720_v31 = vld [vmem:[#allocation16_spill] sm:$0xff]  ;;  %v2721_v60 = vld [vmem:[#allocation51_spill] sm:$0xff]  ;;  %v2722_v11 = vld [vmem:[#allocation26_spill] sm:$0xff] }
 0x111   :  { %v817_v23 = vadd.f32 %v816_v32, %v733_v21  ;;  %v753_v27 = vadd.f32 %v2719_v7, %v2718_v13  ;;  %v757_v9 = vadd.f32 %v2720_v31, %v2062_v35  ;;  %v379_v48 = vadd.f32 %v2722_v11, %v2721_v60 }
 0x112   :  { %v810_v46 = vadd.f32 %v809_v1, %v764_v39  ;;  %v435_v36 = vadd.f32 %v434_v41, %v363_v53  ;;  %v765_v33 = vadd.f32 %v2086_v25, %v2082_v61 }
 0x113   :  { %v818_v3 = vadd.f32 %v817_v23, %v737_v17 }
 0x114   :  { %v832_v24 = vadd.f32 %v810_v46, %v424_v37  ;;  %v436_v62 = vadd.f32 %v435_v36, %v367_v29 }
 0x115   :  { %v819_v18 = vadd.f32 %v818_v3, %v741_v38 }
 0x116   :  { %857 = vst [vmem:[#allocation7 + $0x30] sm:$0xff] %v832_v24  ;;  %v437_v47 = vadd.f32 %v436_v62, %v371_v42 }
 0x117   :  { %v820_v56 = vadd.f32 %v819_v18, %v745_v14 }
 0x118   :  { %v438_v15 = vadd.f32 %v437_v47, %v375_v12 }
 0x119   :  { %v821_v4 = vadd.f32 %v820_v56, %v749_v40 }
 0x11a   :  { %v439_v54 = vadd.f32 %v438_v15, %v379_v48 }
 0x11b   :  { %v822_v6 = vadd.f32 %v821_v4, %v753_v27 }
 0x11d   :  { %v823_v20 = vadd.f32 %v822_v6, %v757_v9 }
 0x11f   :  { %v824_v50 = vadd.f32 %v823_v20, %v761_v59 }
 0x121   :  { %v825_v43 = vadd.f32 %v824_v50, %v765_v33 }
 0x123   :  { %v833_v57 = vadd.f32 %v825_v43, %v439_v54 }
 0x125   :  { %858 = vst [vmem:[#allocation7 + $0x38] sm:$0xff] %v833_v57 }
 0x126   :  { %938 = shalt.err (!%p935_p6)
}
 0x127   :  { %s939_s10 = scalar_lea.hbm %s2243_s2, 1024 }
 0x128   :  { %p940_p7 = scmp.ne.s32.totalorder %s2243_s2, %s939_s10  ;;  %p943_p8 = scmp.lt.u32.totalorder %s939_s10, %s2243_s2 }
 0x12a   :  { %p945_p9 = pnand %p943_p8, %p940_p7 }
 0x12c   :  { %948 = shalt.err (!%p945_p9)
}
 0x12d   :  { %870 = dma.vmem_to_hbm [thread:$0]  %s865_s6, 1024, %s2243_s2, [#allocation4], %s956_s19, %s956_s19, %s957_s20  }
 0x12e   :  { %953 = dma.done.wait [#allocation4], 1024  }
 0x12f   :  { %954 = vsyncadd [#allocation4], 4294966272 }
 0x130   :  { %874 = vsyncpa [#allocation3], 1 }
 0x131   :  { %875 = vsyncpa [#allocation6], 1 }
 0x132   :  { %876 = vsyncpa [#allocation4], 1 }

</bundles_post_ra>
